<compile_context>
chip_gen: v7x
topology: tpu7x:2x2x1
jax: 0.10.0
libtpu: 0.0.40
codegen_flags: <defaults>
</compile_context>

<pallas_src>
import math
import functools

import jax
import jax.numpy as jnp
import numpy as np
from jax.experimental import pallas as pl
from jax.experimental.pallas import tpu as pltpu

# -------------------- config (small, consistent with the module) --------------------
B = 2          # batch
T = 8          # decoder sequence length (== block_size)
I = 8          # encoder sequence length
C = 32         # n_embd
N_HEAD = 4     # n_head
HD = C // N_HEAD
LN_EPS = 1e-5
NEG_INF = -1e30   # large finite negative; exp underflows to 0, never NaN
BF16 = jnp.bfloat16


# -------------------- kernel helpers --------------------
def _layernorm(h, g, b):
    mu = jnp.mean(h, axis=-1, keepdims=True)
    var = jnp.mean((h - mu) ** 2, axis=-1, keepdims=True)
    return (h - mu) * jax.lax.rsqrt(var + LN_EPS) * g + b


def _gelu_tanh(h):
    # GELU(approximate='tanh')
    return 0.5 * h * (1.0 + jnp.tanh(0.7978845608028654 * (h + 0.044715 * h * h * h)))


# -------------------- kernel --------------------
def block_kernel(x_ref, enc_ref, sb_ref, cb_ref,
                 w_qkv_ref, w_cq_ref, w_ckv_ref,
                 w_osa_ref, w_oca_ref, w_fc_ref, w_mo_ref,
                 vec_ref, o_ref, *, n_head):
    n, c = x_ref.shape            # fused decoder rows (B*T), channels
    hd = c // n_head
    scale = 1.0 / math.sqrt(hd)

    x = x_ref[...]                               # (N, C) f32 residual stream
    enc_bf = enc_ref[...].astype(BF16)           # (M, C) bf16 (MXU input only)
    sbias = sb_ref[...]                          # (N, N) additive causal/batch bias
    cbias = cb_ref[...]                          # (N, M) additive batch bias

    # ---- unpack LN gains/biases and projection/MLP biases from the (16,128) slab ----
    ln1_g = vec_ref[0:1, 0:c]
    ln1_b = vec_ref[1:2, 0:c]
    ln2_g = vec_ref[2:3, 0:c]
    ln2_b = vec_ref[3:4, 0:c]
    ln3_g = vec_ref[4:5, 0:c]
    ln3_b = vec_ref[5:6, 0:c]
    b_qkv = vec_ref[6:7, 0:3 * c]
    b_cq = vec_ref[7:8, 0:c]
    b_ckv = vec_ref[8:9, 0:2 * c]
    bo_sa = vec_ref[9:10, 0:c]
    bo_ca = vec_ref[10:11, 0:c]
    bo_ml = vec_ref[11:12, 0:c]
    b_fc = vec_ref[12:13, 0:4 * c]

    def attend_heads(q_all, k_all, v_all, bias):
        # q_all: (N, C) bf16, k_all/v_all: (M, C) bf16, bias: (N, M) f32.
        # Per-head scores/contexts are inherently K=hd; the contexts are
        # re-packed along lanes so the output projection is one K=C matmul.
        ys = []
        for h in range(n_head):
            sl = slice(h * hd, (h + 1) * hd)
            q = q_all[:, sl]
            k = k_all[:, sl]
            v = v_all[:, sl]
            s = jax.lax.dot_general(q, k, (((1,), (1,)), ((), ())),
                                    preferred_element_type=jnp.float32)
            s = s * scale + bias
            mx = jnp.max(s, axis=-1, keepdims=True)
            e = jnp.exp(s - mx)
            denom = jnp.sum(e, axis=-1, keepdims=True)
            p = (e * pl.reciprocal(denom, approx=True)).astype(BF16)
            ys.append(jnp.dot(p, v, preferred_element_type=jnp.float32))
        return jnp.concatenate(ys, axis=-1).astype(BF16)     # (N, C)

    # ---------------- self-attention (causal, block-diagonal over fused batch) ----------------
    h1 = _layernorm(x, ln1_g, ln1_b).astype(BF16)
    qkv = (jnp.dot(h1, w_qkv_ref[...], preferred_element_type=jnp.float32)
           + b_qkv).astype(BF16)                              # (N, 3C)
    y = attend_heads(qkv[:, 0:c], qkv[:, c:2 * c], qkv[:, 2 * c:3 * c], sbias)
    x = x + jnp.dot(y, w_osa_ref[...], preferred_element_type=jnp.float32) + bo_sa

    # ---------------- cross-attention (no causal mask, same-batch only) ----------------
    h2 = _layernorm(x, ln2_g, ln2_b).astype(BF16)
    q_all = (jnp.dot(h2, w_cq_ref[...], preferred_element_type=jnp.float32)
             + b_cq).astype(BF16)                             # (N, C)
    kv = (jnp.dot(enc_bf, w_ckv_ref[...], preferred_element_type=jnp.float32)
          + b_ckv).astype(BF16)                               # (M, 2C)
    y = attend_heads(q_all, kv[:, 0:c], kv[:, c:2 * c], cbias)
    x = x + jnp.dot(y, w_oca_ref[...], preferred_element_type=jnp.float32) + bo_ca

    # ---------------- MLP ----------------
    h3 = _layernorm(x, ln3_g, ln3_b).astype(BF16)
    u = jnp.dot(h3, w_fc_ref[...], preferred_element_type=jnp.float32) + b_fc
    u = _gelu_tanh(u).astype(BF16)
    x = x + jnp.dot(u, w_mo_ref[...], preferred_element_type=jnp.float32) + bo_ml

    o_ref[...] = x.astype(o_ref.dtype)


# -------------------- parameter / mask packing (wrapper side, plain JAX) --------------------
def pack_params(params):
    def row(v, width=128):
        v = jnp.asarray(v, jnp.float32).reshape(1, -1)
        return jnp.pad(v, ((0, 0), (0, width - v.shape[1])))

    # LN params + all small biases packed into one lane-padded (16,128) f32 slab.
    vec = jnp.concatenate([
        row(params["ln1_g"]), row(params["ln1_b"]),
        row(params["ln2_g"]), row(params["ln2_b"]),
        row(params["ln3_g"]), row(params["ln3_b"]),
        row(params["attn_bqkv"]),     # row 6  : (96)
        row(params["ca_bq"]),         # row 7  : (32)
        row(params["ca_bkv"]),        # row 8  : (64)
        row(params["attn_bo"]),       # row 9  : (32)
        row(params["ca_bo"]),         # row 10 : (32)
        row(params["mlp_bo"]),        # row 11 : (32)
        row(params["mlp_bfc"]),       # row 12 : (128)
        jnp.zeros((3, 128), jnp.float32),
    ], axis=0)                        # (16, 128)

    weights = (
        params["attn_wqkv"].astype(BF16),   # (C, 3C)
        params["ca_wq"].astype(BF16),       # (C, C)
        params["ca_wkv"].astype(BF16),      # (C, 2C)
        params["attn_wo"].astype(BF16),     # (C, C)
        params["ca_wo"].astype(BF16),       # (C, C)
        params["mlp_wfc"].astype(BF16),     # (C, 4C)
        params["mlp_wo"].astype(BF16),      # (4C, C)
    )
    return weights, vec


def make_bias_masks(b, t, i):
    # Precomputed additive biases replacing the in-kernel iota/div/compare chains.
    n, m = b * t, b * i
    rq = np.arange(n)[:, None]
    ck = np.arange(n)[None, :]
    self_ok = ((rq // t) == (ck // t)) & (ck <= rq)   # block-diagonal causal
    ce = np.arange(m)[None, :]
    cross_ok = (rq // t) == (ce // i)                 # same batch only
    sbias = np.where(self_ok, 0.0, NEG_INF).astype(np.float32)
    cbias = np.where(cross_ok, 0.0, NEG_INF).astype(np.float32)
    return jnp.asarray(sbias), jnp.asarray(cbias)


# -------------------- wrapper --------------------
def block_forward(x, enc, params, n_head=N_HEAD):
    b, t, c = x.shape
    _, i, _ = enc.shape

    # Batch flattening is pure HBM metadata here (wrapper-side reshape).
    x2d = x.reshape(b * t, c)
    enc2d = enc.reshape(b * i, c)
    sbias, cbias = make_bias_masks(b, t, i)
    weights, vec = pack_params(params)

    operands = (x2d, enc2d, sbias, cbias) + weights + (vec,)

    in_specs = [pl.BlockSpec(op.shape, lambda g, nd=op.ndim: (0,) * nd)
                for op in operands]
    out_spec = pl.BlockSpec((b * t, c), lambda g: (0, 0))

    out2d = pl.pallas_call(
        functools.partial(block_kernel, n_head=n_head),
        out_shape=jax.ShapeDtypeStruct((b * t, c), jnp.float32),
        grid=(1,),                      # batch fused into a single step (see v7x TODO)
        in_specs=in_specs,
        out_specs=out_spec,
        compiler_params=pltpu.CompilerParams(
            dimension_semantics=("arbitrary",)),
    )(*operands)
    return out2d.reshape(b, t, c)


# -------------------- plain-JAX reference (for validation) --------------------
def block_reference(x, enc, params, n_head=N_HEAD):
    def ln(h, g, b):
        mu = jnp.mean(h, axis=-1, keepdims=True)
        var = jnp.mean((h - mu) ** 2, axis=-1, keepdims=True)
        return (h - mu) * jax.lax.rsqrt(var + LN_EPS) * g + b

    bsz, t, c = x.shape
    hd = c // n_head
    p = params

    def heads(a):  # (B, S, C) -> (B, H, S, hd)
        return a.reshape(bsz, -1, n_head, hd).transpose(0, 2, 1, 3)

    # self attention
    h = ln(x, p["ln1_g"], p["ln1_b"])
    qkv = h @ p["attn_wqkv"] + p["attn_bqkv"]
    q, k, v = jnp.split(qkv, 3, axis=-1)
    q, k, v = heads(q), heads(k), heads(v)
    att = (q @ k.transpose(0, 1, 3, 2)) / math.sqrt(hd)
    mask = jnp.tril(jnp.ones((t, t), bool))[None, None]
    att = jnp.where(mask, att, -jnp.inf)
    att = jax.nn.softmax(att, axis=-1)
    y = (att @ v).transpose(0, 2, 1, 3).reshape(bsz, t, c)
    x = x + (y @ p["attn_wo"] + p["attn_bo"])

    # cross attention
    h = ln(x, p["ln2_g"], p["ln2_b"])
    q = heads(h @ p["ca_wq"] + p["ca_bq"])
    kv = enc @ p["ca_wkv"] + p["ca_bkv"]
    k, v = jnp.split(kv, 2, axis=-1)
    k, v = heads(k), heads(v)
    att = (q @ k.transpose(0, 1, 3, 2)) / math.sqrt(hd)
    att = jax.nn.softmax(att, axis=-1)
    y = (att @ v).transpose(0, 2, 1, 3).reshape(bsz, t, c)
    x = x + (y @ p["ca_wo"] + p["ca_bo"])

    # mlp
    h = ln(x, p["ln3_g"], p["ln3_b"])
    h = h @ p["mlp_wfc"] + p["mlp_bfc"]
    h = 0.5 * h * (1.0 + jnp.tanh(0.7978845608028654 * (h + 0.044715 * h ** 3)))
    x = x + (h @ p["mlp_wo"] + p["mlp_bo"])
    return x


# -------------------- parameter init --------------------
def init_params(key):
    ks = jax.random.split(key, 16)
    s = 0.02
    return {
        "ln1_g": jnp.ones((1, C), jnp.float32),
        "ln1_b": jnp.zeros((1, C), jnp.float32),
        "ln2_g": jnp.ones((1, C), jnp.float32),
        "ln2_b": jnp.zeros((1, C), jnp.float32),
        "ln3_g": jnp.ones((1, C), jnp.float32),
        "ln3_b": jnp.zeros((1, C), jnp.float32),
        "attn_wqkv": s * jax.random.normal(ks[0], (C, 3 * C), jnp.float32),
        "attn_bqkv": s * jax.random.normal(ks[1], (1, 3 * C), jnp.float32),
        "attn_wo":   s * jax.random.normal(ks[2], (C, C), jnp.float32),
        "attn_bo":   s * jax.random.normal(ks[3], (1, C), jnp.float32),
        "ca_wq":     s * jax.random.normal(ks[4], (C, C), jnp.float32),
        "ca_bq":     s * jax.random.normal(ks[5], (1, C), jnp.float32),
        "ca_wkv":    s * jax.random.normal(ks[6], (C, 2 * C), jnp.float32),
        "ca_bkv":    s * jax.random.normal(ks[7], (1, 2 * C), jnp.float32),
        "ca_wo":     s * jax.random.normal(ks[8], (C, C), jnp.float32),
        "ca_bo":     s * jax.random.normal(ks[9], (1, C), jnp.float32),
        "mlp_wfc":   s * jax.random.normal(ks[10], (C, 4 * C), jnp.float32),
        "mlp_bfc":   s * jax.random.normal(ks[11], (1, 4 * C), jnp.float32),
        "mlp_wo":    s * jax.random.normal(ks[12], (4 * C, C), jnp.float32),
        "mlp_bo":    s * jax.random.normal(ks[13], (1, C), jnp.float32),
    }


# -------------------- main --------------------
if __name__ == "__main__":
    key = jax.random.PRNGKey(0)
    kx, ke, kp = jax.random.split(key, 3)
    x = jax.random.normal(kx, (B, T, C), jnp.float32)
    enc = jax.random.normal(ke, (B, I, C), jnp.float32)
    params = init_params(kp)

    out = jax.block_until_ready(block_forward(x, enc, params))
    ref = jax.block_until_ready(block_reference(x, enc, params))

    # Tolerance reflects bf16 MXU inputs (weights/activations cast to bf16,
    # f32 accumulation) plus the approximate (EUP) reciprocal in softmax.
    np.testing.assert_allclose(np.asarray(out), np.asarray(ref), rtol=5e-3, atol=5e-3)

    print("KERNEL_OK")
</pallas_src>

<mosaic_0001>
module attributes {stable_mosaic.version = 11 : i64} {
  func.func @block_kernel(%arg0: i32, %arg1: memref<16x32xf32, #tpu.memory_space<vmem>>, %arg2: memref<16x32xf32, #tpu.memory_space<vmem>>, %arg3: memref<16x16xf32, #tpu.memory_space<vmem>>, %arg4: memref<16x16xf32, #tpu.memory_space<vmem>>, %arg5: memref<32x96xbf16, #tpu.memory_space<vmem>>, %arg6: memref<32x32xbf16, #tpu.memory_space<vmem>>, %arg7: memref<32x64xbf16, #tpu.memory_space<vmem>>, %arg8: memref<32x32xbf16, #tpu.memory_space<vmem>>, %arg9: memref<32x32xbf16, #tpu.memory_space<vmem>>, %arg10: memref<32x128xbf16, #tpu.memory_space<vmem>>, %arg11: memref<128x32xbf16, #tpu.memory_space<vmem>>, %arg12: memref<16x128xf32, #tpu.memory_space<vmem>>, %arg13: memref<16x32xf32, #tpu.memory_space<vmem>>) attributes {dimension_semantics = [#tpu.dimension_semantics<arbitrary>], iteration_bounds = array<i64: 1>, scalar_prefetch = 0 : i64, scratch_operands = 0 : i64, tpu.core_type = #tpu.core_type<tc>, window_params = [{pipeline_mode = #tpu.pipeline_mode<synchronous>, transform_indices = @transform_0, window_bounds = array<i64: 16, 32>}, {pipeline_mode = #tpu.pipeline_mode<synchronous>, transform_indices = @transform_1, window_bounds = array<i64: 16, 32>}, {pipeline_mode = #tpu.pipeline_mode<synchronous>, transform_indices = @transform_2, window_bounds = array<i64: 16, 16>}, {pipeline_mode = #tpu.pipeline_mode<synchronous>, transform_indices = @transform_3, window_bounds = array<i64: 16, 16>}, {pipeline_mode = #tpu.pipeline_mode<synchronous>, transform_indices = @transform_4, window_bounds = array<i64: 32, 96>}, {pipeline_mode = #tpu.pipeline_mode<synchronous>, transform_indices = @transform_5, window_bounds = array<i64: 32, 32>}, {pipeline_mode = #tpu.pipeline_mode<synchronous>, transform_indices = @transform_6, window_bounds = array<i64: 32, 64>}, {pipeline_mode = #tpu.pipeline_mode<synchronous>, transform_indices = @transform_7, window_bounds = array<i64: 32, 32>}, {pipeline_mode = #tpu.pipeline_mode<synchronous>, transform_indices = @transform_8, window_bounds = array<i64: 32, 32>}, {pipeline_mode = #tpu.pipeline_mode<synchronous>, transform_indices = @transform_9, window_bounds = array<i64: 32, 128>}, {pipeline_mode = #tpu.pipeline_mode<synchronous>, transform_indices = @transform_10, window_bounds = array<i64: 128, 32>}, {pipeline_mode = #tpu.pipeline_mode<synchronous>, transform_indices = @transform_11, window_bounds = array<i64: 16, 128>}, {pipeline_mode = #tpu.pipeline_mode<synchronous>, transform_indices = @transform_12, window_bounds = array<i64: 16, 32>}]} {
    %c0 = arith.constant 0 : index
    %c0_0 = arith.constant 0 : index
    %0 = vector.load %arg1[%c0, %c0_0] : memref<16x32xf32, #tpu.memory_space<vmem>>, vector<16x32xf32>
    %c0_1 = arith.constant 0 : index
    %c0_2 = arith.constant 0 : index
    %1 = vector.load %arg2[%c0_1, %c0_2] : memref<16x32xf32, #tpu.memory_space<vmem>>, vector<16x32xf32>
    %2 = arith.truncf %1 : vector<16x32xf32> to vector<16x32xbf16>
    %c0_3 = arith.constant 0 : index
    %c0_4 = arith.constant 0 : index
    %3 = vector.load %arg3[%c0_3, %c0_4] : memref<16x16xf32, #tpu.memory_space<vmem>>, vector<16x16xf32>
    %c0_5 = arith.constant 0 : index
    %c0_6 = arith.constant 0 : index
    %4 = vector.load %arg4[%c0_5, %c0_6] : memref<16x16xf32, #tpu.memory_space<vmem>>, vector<16x16xf32>
    %c0_7 = arith.constant 0 : index
    %c0_8 = arith.constant 0 : index
    %5 = vector.load %arg12[%c0_7, %c0_8] : memref<16x128xf32, #tpu.memory_space<vmem>>, vector<1x32xf32>
    %c1 = arith.constant 1 : index
    %c0_9 = arith.constant 0 : index
    %6 = vector.load %arg12[%c1, %c0_9] : memref<16x128xf32, #tpu.memory_space<vmem>>, vector<1x32xf32>
    %c2 = arith.constant 2 : index
    %c0_10 = arith.constant 0 : index
    %7 = vector.load %arg12[%c2, %c0_10] : memref<16x128xf32, #tpu.memory_space<vmem>>, vector<1x32xf32>
    %c3 = arith.constant 3 : index
    %c0_11 = arith.constant 0 : index
    %8 = vector.load %arg12[%c3, %c0_11] : memref<16x128xf32, #tpu.memory_space<vmem>>, vector<1x32xf32>
    %c4 = arith.constant 4 : index
    %c0_12 = arith.constant 0 : index
    %9 = vector.load %arg12[%c4, %c0_12] : memref<16x128xf32, #tpu.memory_space<vmem>>, vector<1x32xf32>
    %c5 = arith.constant 5 : index
    %c0_13 = arith.constant 0 : index
    %10 = vector.load %arg12[%c5, %c0_13] : memref<16x128xf32, #tpu.memory_space<vmem>>, vector<1x32xf32>
    %c6 = arith.constant 6 : index
    %c0_14 = arith.constant 0 : index
    %11 = vector.load %arg12[%c6, %c0_14] : memref<16x128xf32, #tpu.memory_space<vmem>>, vector<1x96xf32>
    %c7 = arith.constant 7 : index
    %c0_15 = arith.constant 0 : index
    %12 = vector.load %arg12[%c7, %c0_15] : memref<16x128xf32, #tpu.memory_space<vmem>>, vector<1x32xf32>
    %c8 = arith.constant 8 : index
    %c0_16 = arith.constant 0 : index
    %13 = vector.load %arg12[%c8, %c0_16] : memref<16x128xf32, #tpu.memory_space<vmem>>, vector<1x64xf32>
    %c9 = arith.constant 9 : index
    %c0_17 = arith.constant 0 : index
    %14 = vector.load %arg12[%c9, %c0_17] : memref<16x128xf32, #tpu.memory_space<vmem>>, vector<1x32xf32>
    %c10 = arith.constant 10 : index
    %c0_18 = arith.constant 0 : index
    %15 = vector.load %arg12[%c10, %c0_18] : memref<16x128xf32, #tpu.memory_space<vmem>>, vector<1x32xf32>
    %c11 = arith.constant 11 : index
    %c0_19 = arith.constant 0 : index
    %16 = vector.load %arg12[%c11, %c0_19] : memref<16x128xf32, #tpu.memory_space<vmem>>, vector<1x32xf32>
    %c12 = arith.constant 12 : index
    %c0_20 = arith.constant 0 : index
    %17 = vector.load %arg12[%c12, %c0_20] : memref<16x128xf32, #tpu.memory_space<vmem>>, vector<1x128xf32>
    %cst = arith.constant dense<0.000000e+00> : vector<16xf32>
    %18 = vector.multi_reduction <add>, %0, %cst [1] : vector<16x32xf32> to vector<16xf32>
    %19 = vector.shape_cast %18 : vector<16xf32> to vector<16x1xf32>
    %cst_21 = arith.constant 3.200000e+01 : f32
    %20 = vector.broadcast %cst_21 : f32 to vector<16x1xf32>
    %21 = arith.divf %19, %20 : vector<16x1xf32>
    %22 = vector.broadcast %21 : vector<16x1xf32> to vector<16x32xf32>
    %23 = arith.subf %0, %22 : vector<16x32xf32>
    %24 = arith.mulf %23, %23 : vector<16x32xf32>
    %cst_22 = arith.constant dense<0.000000e+00> : vector<16xf32>
    %25 = vector.multi_reduction <add>, %24, %cst_22 [1] : vector<16x32xf32> to vector<16xf32>
    %26 = vector.shape_cast %25 : vector<16xf32> to vector<16x1xf32>
    %cst_23 = arith.constant 3.200000e+01 : f32
    %27 = vector.broadcast %cst_23 : f32 to vector<16x1xf32>
    %28 = arith.divf %26, %27 : vector<16x1xf32>
    %29 = vector.broadcast %21 : vector<16x1xf32> to vector<16x32xf32>
    %30 = arith.subf %0, %29 : vector<16x32xf32>
    %cst_24 = arith.constant 9.99999974E-6 : f32
    %31 = vector.broadcast %cst_24 : f32 to vector<16x1xf32>
    %32 = arith.addf %28, %31 : vector<16x1xf32>
    %33 = math.rsqrt %32 : vector<16x1xf32>
    %34 = vector.broadcast %33 : vector<16x1xf32> to vector<16x32xf32>
    %35 = arith.mulf %30, %34 : vector<16x32xf32>
    %36 = vector.broadcast %5 : vector<1x32xf32> to vector<16x32xf32>
    %37 = arith.mulf %35, %36 : vector<16x32xf32>
    %38 = vector.broadcast %6 : vector<1x32xf32> to vector<16x32xf32>
    %39 = arith.addf %37, %38 : vector<16x32xf32>
    %40 = arith.truncf %39 : vector<16x32xf32> to vector<16x32xbf16>
    %c0_25 = arith.constant 0 : index
    %c0_26 = arith.constant 0 : index
    %41 = vector.load %arg5[%c0_25, %c0_26] : memref<32x96xbf16, #tpu.memory_space<vmem>>, vector<32x96xbf16>
    %cst_27 = arith.constant dense<0.000000e+00> : vector<16x96xf32>
    %42 = tpu.matmul %40, %41, %cst_27 {dimension_numbers = #tpu.dot_dimension_numbers<[1], [0], [0], [1], [0, 0, 1, 1], [], []>} : vector<16x32xbf16>, vector<32x96xbf16>, vector<16x96xf32> -> vector<16x96xf32>
    %43 = vector.broadcast %11 : vector<1x96xf32> to vector<16x96xf32>
    %44 = arith.addf %42, %43 : vector<16x96xf32>
    %45 = arith.truncf %44 : vector<16x96xf32> to vector<16x96xbf16>
    %46 = vector.extract_strided_slice %45 {offsets = [0, 0], sizes = [16, 32], strides = [1, 1]} : vector<16x96xbf16> to vector<16x32xbf16>
    %47 = vector.extract_strided_slice %45 {offsets = [0, 32], sizes = [16, 32], strides = [1, 1]} : vector<16x96xbf16> to vector<16x32xbf16>
    %48 = vector.extract_strided_slice %45 {offsets = [0, 64], sizes = [16, 32], strides = [1, 1]} : vector<16x96xbf16> to vector<16x32xbf16>
    %49 = vector.extract_strided_slice %46 {offsets = [0, 0], sizes = [16, 8], strides = [1, 1]} : vector<16x32xbf16> to vector<16x8xbf16>
    %50 = vector.extract_strided_slice %47 {offsets = [0, 0], sizes = [16, 8], strides = [1, 1]} : vector<16x32xbf16> to vector<16x8xbf16>
    %51 = vector.extract_strided_slice %48 {offsets = [0, 0], sizes = [16, 8], strides = [1, 1]} : vector<16x32xbf16> to vector<16x8xbf16>
    %cst_28 = arith.constant dense<0.000000e+00> : vector<16x16xf32>
    %52 = tpu.matmul %49, %50, %cst_28 {dimension_numbers = #tpu.dot_dimension_numbers<[1], [1], [0], [0], [0, 0, 1, 0], [], []>} : vector<16x8xbf16>, vector<16x8xbf16>, vector<16x16xf32> -> vector<16x16xf32>
    %cst_29 = arith.constant 0.353553385 : f32
    %53 = vector.broadcast %cst_29 : f32 to vector<16x16xf32>
    %54 = arith.mulf %52, %53 : vector<16x16xf32>
    %55 = arith.addf %54, %3 : vector<16x16xf32>
    %cst_30 = arith.constant dense<0xFF800000> : vector<16xf32>
    %56 = vector.multi_reduction <maximumf>, %55, %cst_30 [1] : vector<16x16xf32> to vector<16xf32>
    %57 = vector.shape_cast %56 : vector<16xf32> to vector<16x1xf32>
    %58 = vector.broadcast %57 : vector<16x1xf32> to vector<16x16xf32>
    %59 = arith.subf %55, %58 : vector<16x16xf32>
    %60 = math.exp %59 : vector<16x16xf32>
    %cst_31 = arith.constant dense<0.000000e+00> : vector<16xf32>
    %61 = vector.multi_reduction <add>, %60, %cst_31 [1] : vector<16x16xf32> to vector<16xf32>
    %62 = vector.shape_cast %61 : vector<16xf32> to vector<16x1xf32>
    %63 = tpu.reciprocal %62 {approx = true} : vector<16x1xf32> -> vector<16x1xf32>
    %64 = vector.broadcast %63 : vector<16x1xf32> to vector<16x16xf32>
    %65 = arith.mulf %60, %64 : vector<16x16xf32>
    %66 = arith.truncf %65 : vector<16x16xf32> to vector<16x16xbf16>
    %cst_32 = arith.constant dense<0.000000e+00> : vector<16x8xf32>
    %67 = tpu.matmul %66, %51, %cst_32 {dimension_numbers = #tpu.dot_dimension_numbers<[1], [0], [0], [1], [0, 0, 1, 1], [], []>} : vector<16x16xbf16>, vector<16x8xbf16>, vector<16x8xf32> -> vector<16x8xf32>
    %68 = vector.extract_strided_slice %46 {offsets = [0, 8], sizes = [16, 8], strides = [1, 1]} : vector<16x32xbf16> to vector<16x8xbf16>
    %69 = vector.extract_strided_slice %47 {offsets = [0, 8], sizes = [16, 8], strides = [1, 1]} : vector<16x32xbf16> to vector<16x8xbf16>
    %70 = vector.extract_strided_slice %48 {offsets = [0, 8], sizes = [16, 8], strides = [1, 1]} : vector<16x32xbf16> to vector<16x8xbf16>
    %cst_33 = arith.constant dense<0.000000e+00> : vector<16x16xf32>
    %71 = tpu.matmul %68, %69, %cst_33 {dimension_numbers = #tpu.dot_dimension_numbers<[1], [1], [0], [0], [0, 0, 1, 0], [], []>} : vector<16x8xbf16>, vector<16x8xbf16>, vector<16x16xf32> -> vector<16x16xf32>
    %cst_34 = arith.constant 0.353553385 : f32
    %72 = vector.broadcast %cst_34 : f32 to vector<16x16xf32>
    %73 = arith.mulf %71, %72 : vector<16x16xf32>
    %74 = arith.addf %73, %3 : vector<16x16xf32>
    %cst_35 = arith.constant dense<0xFF800000> : vector<16xf32>
    %75 = vector.multi_reduction <maximumf>, %74, %cst_35 [1] : vector<16x16xf32> to vector<16xf32>
    %76 = vector.shape_cast %75 : vector<16xf32> to vector<16x1xf32>
    %77 = vector.broadcast %76 : vector<16x1xf32> to vector<16x16xf32>
    %78 = arith.subf %74, %77 : vector<16x16xf32>
    %79 = math.exp %78 : vector<16x16xf32>
    %cst_36 = arith.constant dense<0.000000e+00> : vector<16xf32>
    %80 = vector.multi_reduction <add>, %79, %cst_36 [1] : vector<16x16xf32> to vector<16xf32>
    %81 = vector.shape_cast %80 : vector<16xf32> to vector<16x1xf32>
    %82 = tpu.reciprocal %81 {approx = true} : vector<16x1xf32> -> vector<16x1xf32>
    %83 = vector.broadcast %82 : vector<16x1xf32> to vector<16x16xf32>
    %84 = arith.mulf %79, %83 : vector<16x16xf32>
    %85 = arith.truncf %84 : vector<16x16xf32> to vector<16x16xbf16>
    %cst_37 = arith.constant dense<0.000000e+00> : vector<16x8xf32>
    %86 = tpu.matmul %85, %70, %cst_37 {dimension_numbers = #tpu.dot_dimension_numbers<[1], [0], [0], [1], [0, 0, 1, 1], [], []>} : vector<16x16xbf16>, vector<16x8xbf16>, vector<16x8xf32> -> vector<16x8xf32>
    %87 = vector.extract_strided_slice %46 {offsets = [0, 16], sizes = [16, 8], strides = [1, 1]} : vector<16x32xbf16> to vector<16x8xbf16>
    %88 = vector.extract_strided_slice %47 {offsets = [0, 16], sizes = [16, 8], strides = [1, 1]} : vector<16x32xbf16> to vector<16x8xbf16>
    %89 = vector.extract_strided_slice %48 {offsets = [0, 16], sizes = [16, 8], strides = [1, 1]} : vector<16x32xbf16> to vector<16x8xbf16>
    %cst_38 = arith.constant dense<0.000000e+00> : vector<16x16xf32>
    %90 = tpu.matmul %87, %88, %cst_38 {dimension_numbers = #tpu.dot_dimension_numbers<[1], [1], [0], [0], [0, 0, 1, 0], [], []>} : vector<16x8xbf16>, vector<16x8xbf16>, vector<16x16xf32> -> vector<16x16xf32>
    %cst_39 = arith.constant 0.353553385 : f32
    %91 = vector.broadcast %cst_39 : f32 to vector<16x16xf32>
    %92 = arith.mulf %90, %91 : vector<16x16xf32>
    %93 = arith.addf %92, %3 : vector<16x16xf32>
    %cst_40 = arith.constant dense<0xFF800000> : vector<16xf32>
    %94 = vector.multi_reduction <maximumf>, %93, %cst_40 [1] : vector<16x16xf32> to vector<16xf32>
    %95 = vector.shape_cast %94 : vector<16xf32> to vector<16x1xf32>
    %96 = vector.broadcast %95 : vector<16x1xf32> to vector<16x16xf32>
    %97 = arith.subf %93, %96 : vector<16x16xf32>
    %98 = math.exp %97 : vector<16x16xf32>
    %cst_41 = arith.constant dense<0.000000e+00> : vector<16xf32>
    %99 = vector.multi_reduction <add>, %98, %cst_41 [1] : vector<16x16xf32> to vector<16xf32>
    %100 = vector.shape_cast %99 : vector<16xf32> to vector<16x1xf32>
    %101 = tpu.reciprocal %100 {approx = true} : vector<16x1xf32> -> vector<16x1xf32>
    %102 = vector.broadcast %101 : vector<16x1xf32> to vector<16x16xf32>
    %103 = arith.mulf %98, %102 : vector<16x16xf32>
    %104 = arith.truncf %103 : vector<16x16xf32> to vector<16x16xbf16>
    %cst_42 = arith.constant dense<0.000000e+00> : vector<16x8xf32>
    %105 = tpu.matmul %104, %89, %cst_42 {dimension_numbers = #tpu.dot_dimension_numbers<[1], [0], [0], [1], [0, 0, 1, 1], [], []>} : vector<16x16xbf16>, vector<16x8xbf16>, vector<16x8xf32> -> vector<16x8xf32>
    %106 = vector.extract_strided_slice %46 {offsets = [0, 24], sizes = [16, 8], strides = [1, 1]} : vector<16x32xbf16> to vector<16x8xbf16>
    %107 = vector.extract_strided_slice %47 {offsets = [0, 24], sizes = [16, 8], strides = [1, 1]} : vector<16x32xbf16> to vector<16x8xbf16>
    %108 = vector.extract_strided_slice %48 {offsets = [0, 24], sizes = [16, 8], strides = [1, 1]} : vector<16x32xbf16> to vector<16x8xbf16>
    %cst_43 = arith.constant dense<0.000000e+00> : vector<16x16xf32>
    %109 = tpu.matmul %106, %107, %cst_43 {dimension_numbers = #tpu.dot_dimension_numbers<[1], [1], [0], [0], [0, 0, 1, 0], [], []>} : vector<16x8xbf16>, vector<16x8xbf16>, vector<16x16xf32> -> vector<16x16xf32>
    %cst_44 = arith.constant 0.353553385 : f32
    %110 = vector.broadcast %cst_44 : f32 to vector<16x16xf32>
    %111 = arith.mulf %109, %110 : vector<16x16xf32>
    %112 = arith.addf %111, %3 : vector<16x16xf32>
    %cst_45 = arith.constant dense<0xFF800000> : vector<16xf32>
    %113 = vector.multi_reduction <maximumf>, %112, %cst_45 [1] : vector<16x16xf32> to vector<16xf32>
    %114 = vector.shape_cast %113 : vector<16xf32> to vector<16x1xf32>
    %115 = vector.broadcast %114 : vector<16x1xf32> to vector<16x16xf32>
    %116 = arith.subf %112, %115 : vector<16x16xf32>
    %117 = math.exp %116 : vector<16x16xf32>
    %cst_46 = arith.constant dense<0.000000e+00> : vector<16xf32>
    %118 = vector.multi_reduction <add>, %117, %cst_46 [1] : vector<16x16xf32> to vector<16xf32>
    %119 = vector.shape_cast %118 : vector<16xf32> to vector<16x1xf32>
    %120 = tpu.reciprocal %119 {approx = true} : vector<16x1xf32> -> vector<16x1xf32>
    %121 = vector.broadcast %120 : vector<16x1xf32> to vector<16x16xf32>
    %122 = arith.mulf %117, %121 : vector<16x16xf32>
    %123 = arith.truncf %122 : vector<16x16xf32> to vector<16x16xbf16>
    %cst_47 = arith.constant dense<0.000000e+00> : vector<16x8xf32>
    %124 = tpu.matmul %123, %108, %cst_47 {dimension_numbers = #tpu.dot_dimension_numbers<[1], [0], [0], [1], [0, 0, 1, 1], [], []>} : vector<16x16xbf16>, vector<16x8xbf16>, vector<16x8xf32> -> vector<16x8xf32>
    %125 = tpu.concatenate %67, %86, %105, %124 in 1 : vector<16x8xf32>, vector<16x8xf32>, vector<16x8xf32>, vector<16x8xf32> -> vector<16x32xf32>
    %126 = arith.truncf %125 : vector<16x32xf32> to vector<16x32xbf16>
    %c0_48 = arith.constant 0 : index
    %c0_49 = arith.constant 0 : index
    %127 = vector.load %arg8[%c0_48, %c0_49] : memref<32x32xbf16, #tpu.memory_space<vmem>>, vector<32x32xbf16>
    %cst_50 = arith.constant dense<0.000000e+00> : vector<16x32xf32>
    %128 = tpu.matmul %126, %127, %cst_50 {dimension_numbers = #tpu.dot_dimension_numbers<[1], [0], [0], [1], [0, 0, 1, 1], [], []>} : vector<16x32xbf16>, vector<32x32xbf16>, vector<16x32xf32> -> vector<16x32xf32>
    %129 = arith.addf %0, %128 : vector<16x32xf32>
    %130 = vector.broadcast %14 : vector<1x32xf32> to vector<16x32xf32>
    %131 = arith.addf %129, %130 : vector<16x32xf32>
    %cst_51 = arith.constant dense<0.000000e+00> : vector<16xf32>
    %132 = vector.multi_reduction <add>, %131, %cst_51 [1] : vector<16x32xf32> to vector<16xf32>
    %133 = vector.shape_cast %132 : vector<16xf32> to vector<16x1xf32>
    %cst_52 = arith.constant 3.200000e+01 : f32
    %134 = vector.broadcast %cst_52 : f32 to vector<16x1xf32>
    %135 = arith.divf %133, %134 : vector<16x1xf32>
    %136 = vector.broadcast %135 : vector<16x1xf32> to vector<16x32xf32>
    %137 = arith.subf %131, %136 : vector<16x32xf32>
    %138 = arith.mulf %137, %137 : vector<16x32xf32>
    %cst_53 = arith.constant dense<0.000000e+00> : vector<16xf32>
    %139 = vector.multi_reduction <add>, %138, %cst_53 [1] : vector<16x32xf32> to vector<16xf32>
    %140 = vector.shape_cast %139 : vector<16xf32> to vector<16x1xf32>
    %cst_54 = arith.constant 3.200000e+01 : f32
    %141 = vector.broadcast %cst_54 : f32 to vector<16x1xf32>
    %142 = arith.divf %140, %141 : vector<16x1xf32>
    %143 = vector.broadcast %135 : vector<16x1xf32> to vector<16x32xf32>
    %144 = arith.subf %131, %143 : vector<16x32xf32>
    %cst_55 = arith.constant 9.99999974E-6 : f32
    %145 = vector.broadcast %cst_55 : f32 to vector<16x1xf32>
    %146 = arith.addf %142, %145 : vector<16x1xf32>
    %147 = math.rsqrt %146 : vector<16x1xf32>
    %148 = vector.broadcast %147 : vector<16x1xf32> to vector<16x32xf32>
    %149 = arith.mulf %144, %148 : vector<16x32xf32>
    %150 = vector.broadcast %7 : vector<1x32xf32> to vector<16x32xf32>
    %151 = arith.mulf %149, %150 : vector<16x32xf32>
    %152 = vector.broadcast %8 : vector<1x32xf32> to vector<16x32xf32>
    %153 = arith.addf %151, %152 : vector<16x32xf32>
    %154 = arith.truncf %153 : vector<16x32xf32> to vector<16x32xbf16>
    %c0_56 = arith.constant 0 : index
    %c0_57 = arith.constant 0 : index
    %155 = vector.load %arg6[%c0_56, %c0_57] : memref<32x32xbf16, #tpu.memory_space<vmem>>, vector<32x32xbf16>
    %cst_58 = arith.constant dense<0.000000e+00> : vector<16x32xf32>
    %156 = tpu.matmul %154, %155, %cst_58 {dimension_numbers = #tpu.dot_dimension_numbers<[1], [0], [0], [1], [0, 0, 1, 1], [], []>} : vector<16x32xbf16>, vector<32x32xbf16>, vector<16x32xf32> -> vector<16x32xf32>
    %157 = vector.broadcast %12 : vector<1x32xf32> to vector<16x32xf32>
    %158 = arith.addf %156, %157 : vector<16x32xf32>
    %159 = arith.truncf %158 : vector<16x32xf32> to vector<16x32xbf16>
    %c0_59 = arith.constant 0 : index
    %c0_60 = arith.constant 0 : index
    %160 = vector.load %arg7[%c0_59, %c0_60] : memref<32x64xbf16, #tpu.memory_space<vmem>>, vector<32x64xbf16>
    %cst_61 = arith.constant dense<0.000000e+00> : vector<16x64xf32>
    %161 = tpu.matmul %2, %160, %cst_61 {dimension_numbers = #tpu.dot_dimension_numbers<[1], [0], [0], [1], [0, 0, 1, 1], [], []>} : vector<16x32xbf16>, vector<32x64xbf16>, vector<16x64xf32> -> vector<16x64xf32>
    %162 = vector.broadcast %13 : vector<1x64xf32> to vector<16x64xf32>
    %163 = arith.addf %161, %162 : vector<16x64xf32>
    %164 = arith.truncf %163 : vector<16x64xf32> to vector<16x64xbf16>
    %165 = vector.extract_strided_slice %164 {offsets = [0, 0], sizes = [16, 32], strides = [1, 1]} : vector<16x64xbf16> to vector<16x32xbf16>
    %166 = vector.extract_strided_slice %164 {offsets = [0, 32], sizes = [16, 32], strides = [1, 1]} : vector<16x64xbf16> to vector<16x32xbf16>
    %167 = vector.extract_strided_slice %159 {offsets = [0, 0], sizes = [16, 8], strides = [1, 1]} : vector<16x32xbf16> to vector<16x8xbf16>
    %168 = vector.extract_strided_slice %165 {offsets = [0, 0], sizes = [16, 8], strides = [1, 1]} : vector<16x32xbf16> to vector<16x8xbf16>
    %169 = vector.extract_strided_slice %166 {offsets = [0, 0], sizes = [16, 8], strides = [1, 1]} : vector<16x32xbf16> to vector<16x8xbf16>
    %cst_62 = arith.constant dense<0.000000e+00> : vector<16x16xf32>
    %170 = tpu.matmul %167, %168, %cst_62 {dimension_numbers = #tpu.dot_dimension_numbers<[1], [1], [0], [0], [0, 0, 1, 0], [], []>} : vector<16x8xbf16>, vector<16x8xbf16>, vector<16x16xf32> -> vector<16x16xf32>
    %cst_63 = arith.constant 0.353553385 : f32
    %171 = vector.broadcast %cst_63 : f32 to vector<16x16xf32>
    %172 = arith.mulf %170, %171 : vector<16x16xf32>
    %173 = arith.addf %172, %4 : vector<16x16xf32>
    %cst_64 = arith.constant dense<0xFF800000> : vector<16xf32>
    %174 = vector.multi_reduction <maximumf>, %173, %cst_64 [1] : vector<16x16xf32> to vector<16xf32>
    %175 = vector.shape_cast %174 : vector<16xf32> to vector<16x1xf32>
    %176 = vector.broadcast %175 : vector<16x1xf32> to vector<16x16xf32>
    %177 = arith.subf %173, %176 : vector<16x16xf32>
    %178 = math.exp %177 : vector<16x16xf32>
    %cst_65 = arith.constant dense<0.000000e+00> : vector<16xf32>
    %179 = vector.multi_reduction <add>, %178, %cst_65 [1] : vector<16x16xf32> to vector<16xf32>
    %180 = vector.shape_cast %179 : vector<16xf32> to vector<16x1xf32>
    %181 = tpu.reciprocal %180 {approx = true} : vector<16x1xf32> -> vector<16x1xf32>
    %182 = vector.broadcast %181 : vector<16x1xf32> to vector<16x16xf32>
    %183 = arith.mulf %178, %182 : vector<16x16xf32>
    %184 = arith.truncf %183 : vector<16x16xf32> to vector<16x16xbf16>
    %cst_66 = arith.constant dense<0.000000e+00> : vector<16x8xf32>
    %185 = tpu.matmul %184, %169, %cst_66 {dimension_numbers = #tpu.dot_dimension_numbers<[1], [0], [0], [1], [0, 0, 1, 1], [], []>} : vector<16x16xbf16>, vector<16x8xbf16>, vector<16x8xf32> -> vector<16x8xf32>
    %186 = vector.extract_strided_slice %159 {offsets = [0, 8], sizes = [16, 8], strides = [1, 1]} : vector<16x32xbf16> to vector<16x8xbf16>
    %187 = vector.extract_strided_slice %165 {offsets = [0, 8], sizes = [16, 8], strides = [1, 1]} : vector<16x32xbf16> to vector<16x8xbf16>
    %188 = vector.extract_strided_slice %166 {offsets = [0, 8], sizes = [16, 8], strides = [1, 1]} : vector<16x32xbf16> to vector<16x8xbf16>
    %cst_67 = arith.constant dense<0.000000e+00> : vector<16x16xf32>
    %189 = tpu.matmul %186, %187, %cst_67 {dimension_numbers = #tpu.dot_dimension_numbers<[1], [1], [0], [0], [0, 0, 1, 0], [], []>} : vector<16x8xbf16>, vector<16x8xbf16>, vector<16x16xf32> -> vector<16x16xf32>
    %cst_68 = arith.constant 0.353553385 : f32
    %190 = vector.broadcast %cst_68 : f32 to vector<16x16xf32>
    %191 = arith.mulf %189, %190 : vector<16x16xf32>
    %192 = arith.addf %191, %4 : vector<16x16xf32>
    %cst_69 = arith.constant dense<0xFF800000> : vector<16xf32>
    %193 = vector.multi_reduction <maximumf>, %192, %cst_69 [1] : vector<16x16xf32> to vector<16xf32>
    %194 = vector.shape_cast %193 : vector<16xf32> to vector<16x1xf32>
    %195 = vector.broadcast %194 : vector<16x1xf32> to vector<16x16xf32>
    %196 = arith.subf %192, %195 : vector<16x16xf32>
    %197 = math.exp %196 : vector<16x16xf32>
    %cst_70 = arith.constant dense<0.000000e+00> : vector<16xf32>
    %198 = vector.multi_reduction <add>, %197, %cst_70 [1] : vector<16x16xf32> to vector<16xf32>
    %199 = vector.shape_cast %198 : vector<16xf32> to vector<16x1xf32>
    %200 = tpu.reciprocal %199 {approx = true} : vector<16x1xf32> -> vector<16x1xf32>
    %201 = vector.broadcast %200 : vector<16x1xf32> to vector<16x16xf32>
    %202 = arith.mulf %197, %201 : vector<16x16xf32>
    %203 = arith.truncf %202 : vector<16x16xf32> to vector<16x16xbf16>
    %cst_71 = arith.constant dense<0.000000e+00> : vector<16x8xf32>
    %204 = tpu.matmul %203, %188, %cst_71 {dimension_numbers = #tpu.dot_dimension_numbers<[1], [0], [0], [1], [0, 0, 1, 1], [], []>} : vector<16x16xbf16>, vector<16x8xbf16>, vector<16x8xf32> -> vector<16x8xf32>
    %205 = vector.extract_strided_slice %159 {offsets = [0, 16], sizes = [16, 8], strides = [1, 1]} : vector<16x32xbf16> to vector<16x8xbf16>
    %206 = vector.extract_strided_slice %165 {offsets = [0, 16], sizes = [16, 8], strides = [1, 1]} : vector<16x32xbf16> to vector<16x8xbf16>
    %207 = vector.extract_strided_slice %166 {offsets = [0, 16], sizes = [16, 8], strides = [1, 1]} : vector<16x32xbf16> to vector<16x8xbf16>
    %cst_72 = arith.constant dense<0.000000e+00> : vector<16x16xf32>
    %208 = tpu.matmul %205, %206, %cst_72 {dimension_numbers = #tpu.dot_dimension_numbers<[1], [1], [0], [0], [0, 0, 1, 0], [], []>} : vector<16x8xbf16>, vector<16x8xbf16>, vector<16x16xf32> -> vector<16x16xf32>
    %cst_73 = arith.constant 0.353553385 : f32
    %209 = vector.broadcast %cst_73 : f32 to vector<16x16xf32>
    %210 = arith.mulf %208, %209 : vector<16x16xf32>
    %211 = arith.addf %210, %4 : vector<16x16xf32>
    %cst_74 = arith.constant dense<0xFF800000> : vector<16xf32>
    %212 = vector.multi_reduction <maximumf>, %211, %cst_74 [1] : vector<16x16xf32> to vector<16xf32>
    %213 = vector.shape_cast %212 : vector<16xf32> to vector<16x1xf32>
    %214 = vector.broadcast %213 : vector<16x1xf32> to vector<16x16xf32>
    %215 = arith.subf %211, %214 : vector<16x16xf32>
    %216 = math.exp %215 : vector<16x16xf32>
    %cst_75 = arith.constant dense<0.000000e+00> : vector<16xf32>
    %217 = vector.multi_reduction <add>, %216, %cst_75 [1] : vector<16x16xf32> to vector<16xf32>
    %218 = vector.shape_cast %217 : vector<16xf32> to vector<16x1xf32>
    %219 = tpu.reciprocal %218 {approx = true} : vector<16x1xf32> -> vector<16x1xf32>
    %220 = vector.broadcast %219 : vector<16x1xf32> to vector<16x16xf32>
    %221 = arith.mulf %216, %220 : vector<16x16xf32>
    %222 = arith.truncf %221 : vector<16x16xf32> to vector<16x16xbf16>
    %cst_76 = arith.constant dense<0.000000e+00> : vector<16x8xf32>
    %223 = tpu.matmul %222, %207, %cst_76 {dimension_numbers = #tpu.dot_dimension_numbers<[1], [0], [0], [1], [0, 0, 1, 1], [], []>} : vector<16x16xbf16>, vector<16x8xbf16>, vector<16x8xf32> -> vector<16x8xf32>
    %224 = vector.extract_strided_slice %159 {offsets = [0, 24], sizes = [16, 8], strides = [1, 1]} : vector<16x32xbf16> to vector<16x8xbf16>
    %225 = vector.extract_strided_slice %165 {offsets = [0, 24], sizes = [16, 8], strides = [1, 1]} : vector<16x32xbf16> to vector<16x8xbf16>
    %226 = vector.extract_strided_slice %166 {offsets = [0, 24], sizes = [16, 8], strides = [1, 1]} : vector<16x32xbf16> to vector<16x8xbf16>
    %cst_77 = arith.constant dense<0.000000e+00> : vector<16x16xf32>
    %227 = tpu.matmul %224, %225, %cst_77 {dimension_numbers = #tpu.dot_dimension_numbers<[1], [1], [0], [0], [0, 0, 1, 0], [], []>} : vector<16x8xbf16>, vector<16x8xbf16>, vector<16x16xf32> -> vector<16x16xf32>
    %cst_78 = arith.constant 0.353553385 : f32
    %228 = vector.broadcast %cst_78 : f32 to vector<16x16xf32>
    %229 = arith.mulf %227, %228 : vector<16x16xf32>
    %230 = arith.addf %229, %4 : vector<16x16xf32>
    %cst_79 = arith.constant dense<0xFF800000> : vector<16xf32>
    %231 = vector.multi_reduction <maximumf>, %230, %cst_79 [1] : vector<16x16xf32> to vector<16xf32>
    %232 = vector.shape_cast %231 : vector<16xf32> to vector<16x1xf32>
    %233 = vector.broadcast %232 : vector<16x1xf32> to vector<16x16xf32>
    %234 = arith.subf %230, %233 : vector<16x16xf32>
    %235 = math.exp %234 : vector<16x16xf32>
    %cst_80 = arith.constant dense<0.000000e+00> : vector<16xf32>
    %236 = vector.multi_reduction <add>, %235, %cst_80 [1] : vector<16x16xf32> to vector<16xf32>
    %237 = vector.shape_cast %236 : vector<16xf32> to vector<16x1xf32>
    %238 = tpu.reciprocal %237 {approx = true} : vector<16x1xf32> -> vector<16x1xf32>
    %239 = vector.broadcast %238 : vector<16x1xf32> to vector<16x16xf32>
    %240 = arith.mulf %235, %239 : vector<16x16xf32>
    %241 = arith.truncf %240 : vector<16x16xf32> to vector<16x16xbf16>
    %cst_81 = arith.constant dense<0.000000e+00> : vector<16x8xf32>
    %242 = tpu.matmul %241, %226, %cst_81 {dimension_numbers = #tpu.dot_dimension_numbers<[1], [0], [0], [1], [0, 0, 1, 1], [], []>} : vector<16x16xbf16>, vector<16x8xbf16>, vector<16x8xf32> -> vector<16x8xf32>
    %243 = tpu.concatenate %185, %204, %223, %242 in 1 : vector<16x8xf32>, vector<16x8xf32>, vector<16x8xf32>, vector<16x8xf32> -> vector<16x32xf32>
    %244 = arith.truncf %243 : vector<16x32xf32> to vector<16x32xbf16>
    %c0_82 = arith.constant 0 : index
    %c0_83 = arith.constant 0 : index
    %245 = vector.load %arg9[%c0_82, %c0_83] : memref<32x32xbf16, #tpu.memory_space<vmem>>, vector<32x32xbf16>
    %cst_84 = arith.constant dense<0.000000e+00> : vector<16x32xf32>
    %246 = tpu.matmul %244, %245, %cst_84 {dimension_numbers = #tpu.dot_dimension_numbers<[1], [0], [0], [1], [0, 0, 1, 1], [], []>} : vector<16x32xbf16>, vector<32x32xbf16>, vector<16x32xf32> -> vector<16x32xf32>
    %247 = arith.addf %131, %246 : vector<16x32xf32>
    %248 = vector.broadcast %15 : vector<1x32xf32> to vector<16x32xf32>
    %249 = arith.addf %247, %248 : vector<16x32xf32>
    %cst_85 = arith.constant dense<0.000000e+00> : vector<16xf32>
    %250 = vector.multi_reduction <add>, %249, %cst_85 [1] : vector<16x32xf32> to vector<16xf32>
    %251 = vector.shape_cast %250 : vector<16xf32> to vector<16x1xf32>
    %cst_86 = arith.constant 3.200000e+01 : f32
    %252 = vector.broadcast %cst_86 : f32 to vector<16x1xf32>
    %253 = arith.divf %251, %252 : vector<16x1xf32>
    %254 = vector.broadcast %253 : vector<16x1xf32> to vector<16x32xf32>
    %255 = arith.subf %249, %254 : vector<16x32xf32>
    %256 = arith.mulf %255, %255 : vector<16x32xf32>
    %cst_87 = arith.constant dense<0.000000e+00> : vector<16xf32>
    %257 = vector.multi_reduction <add>, %256, %cst_87 [1] : vector<16x32xf32> to vector<16xf32>
    %258 = vector.shape_cast %257 : vector<16xf32> to vector<16x1xf32>
    %cst_88 = arith.constant 3.200000e+01 : f32
    %259 = vector.broadcast %cst_88 : f32 to vector<16x1xf32>
    %260 = arith.divf %258, %259 : vector<16x1xf32>
    %261 = vector.broadcast %253 : vector<16x1xf32> to vector<16x32xf32>
    %262 = arith.subf %249, %261 : vector<16x32xf32>
    %cst_89 = arith.constant 9.99999974E-6 : f32
    %263 = vector.broadcast %cst_89 : f32 to vector<16x1xf32>
    %264 = arith.addf %260, %263 : vector<16x1xf32>
    %265 = math.rsqrt %264 : vector<16x1xf32>
    %266 = vector.broadcast %265 : vector<16x1xf32> to vector<16x32xf32>
    %267 = arith.mulf %262, %266 : vector<16x32xf32>
    %268 = vector.broadcast %9 : vector<1x32xf32> to vector<16x32xf32>
    %269 = arith.mulf %267, %268 : vector<16x32xf32>
    %270 = vector.broadcast %10 : vector<1x32xf32> to vector<16x32xf32>
    %271 = arith.addf %269, %270 : vector<16x32xf32>
    %272 = arith.truncf %271 : vector<16x32xf32> to vector<16x32xbf16>
    %c0_90 = arith.constant 0 : index
    %c0_91 = arith.constant 0 : index
    %273 = vector.load %arg10[%c0_90, %c0_91] : memref<32x128xbf16, #tpu.memory_space<vmem>>, vector<32x128xbf16>
    %cst_92 = arith.constant dense<0.000000e+00> : vector<16x128xf32>
    %274 = tpu.matmul %272, %273, %cst_92 {dimension_numbers = #tpu.dot_dimension_numbers<[1], [0], [0], [1], [0, 0, 1, 1], [], []>} : vector<16x32xbf16>, vector<32x128xbf16>, vector<16x128xf32> -> vector<16x128xf32>
    %275 = vector.broadcast %17 : vector<1x128xf32> to vector<16x128xf32>
    %276 = arith.addf %274, %275 : vector<16x128xf32>
    %cst_93 = arith.constant 5.000000e-01 : f32
    %277 = vector.broadcast %cst_93 : f32 to vector<16x128xf32>
    %278 = arith.mulf %277, %276 : vector<16x128xf32>
    %cst_94 = arith.constant 4.471500e-02 : f32
    %279 = vector.broadcast %cst_94 : f32 to vector<16x128xf32>
    %280 = arith.mulf %279, %276 : vector<16x128xf32>
    %281 = arith.mulf %280, %276 : vector<16x128xf32>
    %282 = arith.mulf %281, %276 : vector<16x128xf32>
    %283 = arith.addf %276, %282 : vector<16x128xf32>
    %cst_95 = arith.constant 0.797884583 : f32
    %284 = vector.broadcast %cst_95 : f32 to vector<16x128xf32>
    %285 = arith.mulf %284, %283 : vector<16x128xf32>
    %286 = math.tanh %285 : vector<16x128xf32>
    %cst_96 = arith.constant 1.000000e+00 : f32
    %287 = vector.broadcast %cst_96 : f32 to vector<16x128xf32>
    %288 = arith.addf %287, %286 : vector<16x128xf32>
    %289 = arith.mulf %278, %288 : vector<16x128xf32>
    %290 = arith.truncf %289 : vector<16x128xf32> to vector<16x128xbf16>
    %c0_97 = arith.constant 0 : index
    %c0_98 = arith.constant 0 : index
    %291 = vector.load %arg11[%c0_97, %c0_98] : memref<128x32xbf16, #tpu.memory_space<vmem>>, vector<128x32xbf16>
    %cst_99 = arith.constant dense<0.000000e+00> : vector<16x32xf32>
    %292 = tpu.matmul %290, %291, %cst_99 {dimension_numbers = #tpu.dot_dimension_numbers<[1], [0], [0], [1], [0, 0, 1, 1], [], []>} : vector<16x128xbf16>, vector<128x32xbf16>, vector<16x32xf32> -> vector<16x32xf32>
    %293 = arith.addf %249, %292 : vector<16x32xf32>
    %294 = vector.broadcast %16 : vector<1x32xf32> to vector<16x32xf32>
    %295 = arith.addf %293, %294 : vector<16x32xf32>
    %c0_100 = arith.constant 0 : index
    %c0_101 = arith.constant 0 : index
    %296 = vector.load %arg13[%c0_100, %c0_101] : memref<16x32xf32, #tpu.memory_space<vmem>>, vector<16x32xf32>
    tpu.vector_store %arg13[%c0_100, %c0_101], %295 {strides = array<i32>} : memref<16x32xf32, #tpu.memory_space<vmem>>, vector<16x32xf32>,
    return
  }
  func.func @transform_0(%arg0: i32) -> (i32, i32) {
    %c0_i32 = arith.constant 0 : i32
    %c0_i32_0 = arith.constant 0 : i32
    %c0_i32_1 = arith.constant 0 : i32
    return %c0_i32, %c0_i32_0 : i32, i32
  }
  func.func @transform_1(%arg0: i32) -> (i32, i32) {
    %c0_i32 = arith.constant 0 : i32
    %c0_i32_0 = arith.constant 0 : i32
    %c0_i32_1 = arith.constant 0 : i32
    return %c0_i32, %c0_i32_0 : i32, i32
  }
  func.func @transform_2(%arg0: i32) -> (i32, i32) {
    %c0_i32 = arith.constant 0 : i32
    %c0_i32_0 = arith.constant 0 : i32
    %c0_i32_1 = arith.constant 0 : i32
    return %c0_i32, %c0_i32_0 : i32, i32
  }
  func.func @transform_3(%arg0: i32) -> (i32, i32) {
    %c0_i32 = arith.constant 0 : i32
    %c0_i32_0 = arith.constant 0 : i32
    %c0_i32_1 = arith.constant 0 : i32
    return %c0_i32, %c0_i32_0 : i32, i32
  }
  func.func @transform_4(%arg0: i32) -> (i32, i32) {
    %c0_i32 = arith.constant 0 : i32
    %c0_i32_0 = arith.constant 0 : i32
    %c0_i32_1 = arith.constant 0 : i32
    return %c0_i32, %c0_i32_0 : i32, i32
  }
  func.func @transform_5(%arg0: i32) -> (i32, i32) {
    %c0_i32 = arith.constant 0 : i32
    %c0_i32_0 = arith.constant 0 : i32
    %c0_i32_1 = arith.constant 0 : i32
    return %c0_i32, %c0_i32_0 : i32, i32
  }
  func.func @transform_6(%arg0: i32) -> (i32, i32) {
    %c0_i32 = arith.constant 0 : i32
    %c0_i32_0 = arith.constant 0 : i32
    %c0_i32_1 = arith.constant 0 : i32
    return %c0_i32, %c0_i32_0 : i32, i32
  }
  func.func @transform_7(%arg0: i32) -> (i32, i32) {
    %c0_i32 = arith.constant 0 : i32
    %c0_i32_0 = arith.constant 0 : i32
    %c0_i32_1 = arith.constant 0 : i32
    return %c0_i32, %c0_i32_0 : i32, i32
  }
  func.func @transform_8(%arg0: i32) -> (i32, i32) {
    %c0_i32 = arith.constant 0 : i32
    %c0_i32_0 = arith.constant 0 : i32
    %c0_i32_1 = arith.constant 0 : i32
    return %c0_i32, %c0_i32_0 : i32, i32
  }
  func.func @transform_9(%arg0: i32) -> (i32, i32) {
    %c0_i32 = arith.constant 0 : i32
    %c0_i32_0 = arith.constant 0 : i32
    %c0_i32_1 = arith.constant 0 : i32
    return %c0_i32, %c0_i32_0 : i32, i32
  }
  func.func @transform_10(%arg0: i32) -> (i32, i32) {
    %c0_i32 = arith.constant 0 : i32
    %c0_i32_0 = arith.constant 0 : i32
    %c0_i32_1 = arith.constant 0 : i32
    return %c0_i32, %c0_i32_0 : i32, i32
  }
  func.func @transform_11(%arg0: i32) -> (i32, i32) {
    %c0_i32 = arith.constant 0 : i32
    %c0_i32_0 = arith.constant 0 : i32
    %c0_i32_1 = arith.constant 0 : i32
    return %c0_i32, %c0_i32_0 : i32, i32
  }
  func.func @transform_12(%arg0: i32) -> (i32, i32) {
    %c0_i32 = arith.constant 0 : i32
    %c0_i32_0 = arith.constant 0 : i32
    %c0_i32_1 = arith.constant 0 : i32
    return %c0_i32, %c0_i32_0 : i32, i32
  }
}

</mosaic_0001>

<bundles_post_ra>
// kernel: tpu_custom_call.1
= control target key start
LH: loop header
LB: loop body
LE: loop exit
PB: predicated region body
PF: predicated region fallthrough
CT: control target
= control target key end

     0   :  { %17 = vsyncpa [#allocation3], 0  ;;  %s2965_s0 = inlined_call_operand.vmem [shape: f32[16,32], index: 0, kind: input, shape index: {}]   ;;  %s2966_s1 = inlined_call_operand.vmem [shape: f32[16,32], index: 1, kind: input, shape index: {}]   ;;  %s2967_s2 = inlined_call_operand.vmem [shape: f32[16,16], index: 2, kind: input, shape index: {}]   ;;  %s2968_s3 = inlined_call_operand.vmem [shape: f32[16,16], index: 3, kind: input, shape index: {}]   ;;  %s2969_s4 = inlined_call_operand.vmem [shape: bf16[32,96], index: 4, kind: input, shape index: {}]   ;;  %s2970_s5 = inlined_call_operand.hbm [shape: bf16[32,32], index: 5, kind: input, shape index: {}]   ;;  %s2971_s6 = inlined_call_operand.hbm [shape: bf16[32,64], index: 6, kind: input, shape index: {}]   ;;  %s2972_s7 = inlined_call_operand.hbm [shape: bf16[32,32], index: 7, kind: input, shape index: {}]   ;;  %s2973_s8 = inlined_call_operand.hbm [shape: bf16[32,32], index: 8, kind: input, shape index: {}]   ;;  %s2974_s9 = inlined_call_operand.vmem [shape: bf16[32,128], index: 9, kind: input, shape index: {}]   ;;  %s2975_s10 = inlined_call_operand.vmem [shape: bf16[128,32], index: 10, kind: input, shape index: {}]   ;;  %s2976_s11 = inlined_call_operand.hbm [shape: f32[16,128], index: 11, kind: input, shape index: {}]   ;;  %s2977_s12 = inlined_call_operand.hbm [shape: f32[16,32], index: 12, kind: output, shape index: {}]  }
   0x1   :  { %18 = vsyncpa [#allocation6], 0 }
   0x2   :  { %19 = vsyncpa [#allocation9], 0 }
   0x3   :  { %20 = vsyncpa [#allocation4], 0  ;;  %s2434_s21 = smov [#allocation5]   ;;  %s2435_s23 = smov [#allocation8]  }
   0x4   :  { %s48_s22 = sshll.u32 %s2434_s21, 4  ;;  %s72_s24 = sshll.u32 %s2435_s23, 4  ;;  %s49_s22 = int_to_ptr.vmem [resolvable:$true] %s48_s22  ;;  %s2523_s24 = int_to_ptr.vmem [resolvable:$true] %s72_s24 }
   0x5   :  { %s2294_s27 = scalar_lea.hbm %s2971_s6, 256 }
   0x6   :  { %p2295_p0 = scmp.ne.s32.totalorder %s2971_s6, %s2294_s27  ;;  %p2298_p1 = scmp.lt.u32.totalorder %s2294_s27, %s2971_s6 }
   0x8   :  { %p2300_p2 = pnand %p2298_p1, %p2295_p0 }
   0xa   :  { %2303 = shalt.err (!%p2300_p2)
}
   0xb   :  { %s2304_s14 = scalar_lea.vmem %s49_s22, 256  ;;  %p2309_p4 = scmp.lt.s32.totalorder %s49_s22, %s49_s22 }
   0xc   :  { %p2305_p3 = scmp.ne.s32.totalorder %s49_s22, %s2304_s14  ;;  %p2310_p5 = scmp.lt.s32.totalorder %s2304_s14, %s2304_s14 }
   0xe   :  { %p2311_p6 = por %p2310_p5, %p2309_p4 }
  0x10   :  { %p2312_p7 = pnand %p2311_p6, %p2305_p3 }
  0x12   :  { %2315 = shalt.err (!%p2312_p7)
}
  0x13   :  { %s2436_s15 = smov 64   ;;  %s2437_s16 = smov 4  }
  0x14   :  { %54 = dma.hbm_to_vmem [thread:$0]  %s2971_s6, 256, %s49_s22, [#allocation6], %s2436_s15, %s2436_s15, %s2437_s16  }
  0x15   :  { %s2316_s21 = scalar_lea.hbm %s2973_s8, 256 }
  0x16   :  { %p2317_p8 = scmp.ne.s32.totalorder %s2973_s8, %s2316_s21  ;;  %p2320_p9 = scmp.lt.u32.totalorder %s2316_s21, %s2973_s8 }
  0x18   :  { %p2322_p10 = pnand %p2320_p9, %p2317_p8 }
  0x1a   :  { %2325 = shalt.err (!%p2322_p10)
}
  0x1b   :  { %s2326_s28 = scalar_lea.vmem %s2523_s24, 256  ;;  %p2331_p12 = scmp.lt.s32.totalorder %s2523_s24, %s2523_s24 }
  0x1c   :  { %p2327_p11 = scmp.ne.s32.totalorder %s2523_s24, %s2326_s28  ;;  %p2332_p13 = scmp.lt.s32.totalorder %s2326_s28, %s2326_s28 }
  0x1e   :  { %p2333_p0 = por %p2332_p13, %p2331_p12 }
  0x20   :  { %p2334_p1 = pnand %p2333_p0, %p2327_p11 }
  0x22   :  { %2337 = shalt.err (!%p2334_p1)
}
  0x23   :  { %78 = dma.hbm_to_vmem [thread:$0]  %s2973_s8, 256, %s2523_s24, [#allocation9], %s2436_s15, %s2436_s15, %s2437_s16  }
  0x24   :  { %s2438_s29 = smov [#allocation2]   ;;  %s2439_s13 = smov [#allocation7]  }
  0x25   :  { %s36_s30 = sshll.u32 %s2438_s29, 4  ;;  %s60_s14 = sshll.u32 %s2439_s13, 4  ;;  %s37_s30 = int_to_ptr.vmem [resolvable:$true] %s36_s30  ;;  %s2560_s14 = int_to_ptr.vmem [resolvable:$true] %s60_s14 }
  0x26   :  { %s2338_s19 = scalar_lea.hbm %s2970_s5, 256 }
  0x27   :  { %p2339_p2 = scmp.ne.s32.totalorder %s2970_s5, %s2338_s19  ;;  %p2342_p3 = scmp.lt.u32.totalorder %s2338_s19, %s2970_s5 }
  0x29   :  { %p2344_p4 = pnand %p2342_p3, %p2339_p2 }
  0x2b   :  { %2347 = shalt.err (!%p2344_p4)
}
  0x2c   :  { %s2348_s8 = scalar_lea.vmem %s37_s30, 256  ;;  %p2353_p6 = scmp.lt.s32.totalorder %s37_s30, %s37_s30 }
  0x2d   :  { %p2349_p5 = scmp.ne.s32.totalorder %s37_s30, %s2348_s8  ;;  %p2354_p7 = scmp.lt.s32.totalorder %s2348_s8, %s2348_s8 }
  0x2f   :  { %p2355_p8 = por %p2354_p7, %p2353_p6 }
  0x31   :  { %p2356_p9 = pnand %p2355_p8, %p2349_p5 }
  0x33   :  { %2359 = shalt.err (!%p2356_p9)
}
  0x34   :  { %42 = dma.hbm_to_vmem [thread:$0]  %s2970_s5, 256, %s37_s30, [#allocation3], %s2436_s15, %s2436_s15, %s2437_s16  }
  0x35   :  { %s2360_s6 = scalar_lea.hbm %s2972_s7, 256 }
  0x36   :  { %p2361_p10 = scmp.ne.s32.totalorder %s2972_s7, %s2360_s6  ;;  %p2364_p11 = scmp.lt.u32.totalorder %s2360_s6, %s2972_s7 }
  0x38   :  { %p2366_p12 = pnand %p2364_p11, %p2361_p10 }
  0x3a   :  { %2369 = shalt.err (!%p2366_p12)
}
  0x3b   :  { %s2370_s18 = scalar_lea.vmem %s2560_s14, 256  ;;  %p2375_p0 = scmp.lt.s32.totalorder %s2560_s14, %s2560_s14 }
  0x3c   :  { %p2371_p13 = scmp.ne.s32.totalorder %s2560_s14, %s2370_s18  ;;  %p2376_p1 = scmp.lt.s32.totalorder %s2370_s18, %s2370_s18 }
  0x3e   :  { %p2377_p2 = por %p2376_p1, %p2375_p0 }
  0x40   :  { %p2378_p3 = pnand %p2377_p2, %p2371_p13 }
  0x42   :  { %2381 = shalt.err (!%p2378_p3)
}
  0x43   :  { %66 = dma.hbm_to_vmem [thread:$0]  %s2972_s7, 256, %s2560_s14, [#allocation6], %s2436_s15, %s2436_s15, %s2437_s16  }
  0x44   :  { %s2440_s19 = smov [#allocation10]   ;;  %s2382_s25 = scalar_lea.hbm %s2976_s11, 256 }
  0x45   :  { %s88_s20 = sshll.u32 %s2440_s19, 4  ;;  %p2383_p4 = scmp.ne.s32.totalorder %s2976_s11, %s2382_s25  ;;  %s89_s20 = int_to_ptr.vmem [resolvable:$true] %s88_s20 }
  0x46   :  { %p2386_p5 = scmp.lt.u32.totalorder %s2382_s25, %s2976_s11 }
  0x48   :  { %p2388_p6 = pnand %p2386_p5, %p2383_p4 }
  0x4a   :  { %2391 = shalt.err (!%p2388_p6)
}
  0x4b   :  { %s2392_s28 = scalar_lea.vmem %s89_s20, 256  ;;  %p2397_p8 = scmp.lt.s32.totalorder %s89_s20, %s89_s20 }
  0x4c   :  { %p2393_p7 = scmp.ne.s32.totalorder %s89_s20, %s2392_s28  ;;  %p2398_p9 = scmp.lt.s32.totalorder %s2392_s28, %s2392_s28 }
  0x4e   :  { %p2399_p10 = por %p2398_p9, %p2397_p8 }
  0x50   :  { %p2400_p11 = pnand %p2399_p10, %p2393_p7 }
  0x52   :  { %2403 = shalt.err (!%p2400_p11)
}
  0x53   :  { %s2441_s7 = smov 128   ;;  %s2442_s16 = smov 8  }
  0x54   :  { %94 = dma.hbm_to_vmem [thread:$0]  %s2976_s11, 256, %s89_s20, [#allocation9], %s2441_s7, %s2441_s7, %s2442_s16  }
  0x55   :  { %2426 = dma.done.wait [#allocation3], 256  }
  0x56   :  { %2427 = vsyncadd [#allocation3], 4294967040 }
  0x57   :  { %2428 = dma.done.wait [#allocation6], 512  }
  0x58   :  { %2429 = vsyncadd [#allocation6], 4294966784 }
  0x59   :  { %2430 = dma.done.wait [#allocation9], 512  }
  0x5a   :  { %2431 = vsyncadd [#allocation9], 4294966784  ;;  %vm133_vm0 = vcmask 261120   ;;  %v2615_v0 = vld [vmem:[%s2965_s0] sm:$0xff]  ;;  %v2620_v1 = vld [vmem:[%s2965_s0 + $0x8] sm:$0xff]  ;;  %v2443_v15 = vmov 0.0  }
  0x5b   :  { %v134_v2 = vsel %vm133_vm0, %v2615_v0, 0.0  ;;  %v137_v3 = vsel %vm133_vm0, %v2620_v1, 0.0  ;;  %v2194_v14 = vld [vmem:[%s2969_s4] sm:$0xff]   ;;  %1976 = vmatprep.subr.bf16.mxu1 %v2443_v15  ;;  %2002 = vmatprep.subr.bf16.mxu0 %v2443_v15  ;;  %v2195_v16 = vld [vmem:[%s2969_s4 + $0x8] sm:$0xff]   ;;  %vm2444_vm1 = vmmov 0   ;;  %s2445_s4 = smov 96  }
  0x5c   :  { %135 = vadd.xlane.f32.xlu0 %v134_v2  ;;  %1977 = vmatpush3.bf16.msra.mxu1 %v2194_v14  ;;  %v1862_v25 = vld [vmem:[#allocation10] ss:$0 sm:$0xff]  ;;  %v1863_v29 = vld [vmem:[#allocation10 + $0x1] ss:$0 sm:$0xff]  ;;  %v1864_v34 = vld [vmem:[#allocation10 + $0x6] ss:$0 sm:$0xff] }
  0x5d   :  { %1980 = vmatprep.mubr.msk.bf16.mxu1 %vm2444_vm1, %v2443_v15  ;;  %1978 = vmatprep.subr.bf16.mxu1 %v2443_v15  ;;  %s2446_s30 = smov 88   ;;  %s2447_s19 = smov 120   ;;  %vm242_vm2 = vcmask 64512   ;;  %v2668_v45 = vld [vmem:[%s2967_s2] sm:$0xff]  ;;  %vm294_vm3 = vcmask 130048   ;;  %v2673_v49 = vld [vmem:[%s2967_s2 + $0x8] sm:$0xff] }
  0x5e   :  { %2004 = vmatprep.mubr.msk.bf16.mxu0 %vm2444_vm1, %v2443_v15  ;;  %s2448_s20 = smov 80   ;;  %s2449_s21 = smov 72   ;;  %vm768_vm4 = vcmask 195584  }
  0x5f   :  { %s2450_s2 = smov 112   ;;  %s2451_s26 = smov 104  }
  0x60   :  { %138 = vadd.xlane.f32.xlu0 %v137_v3  ;;  %1979 = vmatpush3.bf16.msra.mxu1 %v2195_v16  ;;  %s2453_s27 = smov 56   ;;  %s2454_s28 = smov 40  }
  0x61   :  { %1984 = vmatprep.subr.bf16.mxu1 %v2443_v15  ;;  %s2455_s14 = smov 16   ;;  %s2456_s6 = smov 24  }
  0xe9   :  { %v136_v4 = vpop.xlane.xlu0 %135 }
  0xea   :  { %v141_v5 = vmul.f32 0.03125, %v136_v4 }
  0xec   :  { %v143_v6 = vsub.f32 %v2615_v0, %v141_v5 }
  0xed   :  { %v139_v7 = vpop.xlane.xlu0 %138 }
  0xee   :  { %v142_v8 = vmul.f32 0.03125, %v139_v7  ;;  %v145_v9 = vmul.f32 %v143_v6, %v143_v6 }
  0xf0   :  { %v144_v10 = vsub.f32 %v2620_v1, %v142_v8  ;;  %v147_v11 = vsel %vm133_vm0, %v145_v9, 0.0 }
  0xf1   :  { %148 = vadd.xlane.f32.xlu1 %v147_v11 }
  0xf2   :  { %v146_v12 = vmul.f32 %v144_v10, %v144_v10 }
  0xf4   :  { %v150_v13 = vsel %vm133_vm0, %v146_v12, 0.0 }
  0xf5   :  { %151 = vadd.xlane.f32.xlu1 %v150_v13 }
 0x17e   :  { %v149_v17 = vpop.xlane.xlu1 %148 }
 0x17f   :  { %v153_v18 = vmul.f32 0.03125, %v149_v17 }
 0x181   :  { %v155_v19 = vadd.f32 1e-05, %v153_v18 }
 0x182   :  { %v152_v20 = vpop.xlane.xlu1 %151 }
 0x183   :  { %2214 = vrsqrt.f32 %v155_v19  ;;  %v154_v21 = vmul.f32 0.03125, %v152_v20 }
 0x185   :  { %v156_v22 = vadd.f32 1e-05, %v154_v21 }
 0x187   :  { %2216 = vrsqrt.f32 %v156_v22 }
 0x18d   :  { %v2215_v23 = vpop.eup %2214 }
 0x18e   :  { %v159_v24 = vmul.f32 %v2215_v23, %v143_v6 }
 0x190   :  { %v165_v28 = vmul.f32 %v1862_v25, %v159_v24 }
 0x191   :  { %v2217_v26 = vpop.eup %2216 }
 0x192   :  { %v160_v27 = vmul.f32 %v2217_v26, %v144_v10  ;;  %v171_v31 = vadd.f32 %v1863_v29, %v165_v28 }
 0x194   :  { %v166_v30 = vmul.f32 %v1862_v25, %v160_v27 }
 0x196   :  { %v172_v32 = vadd.f32 %v1863_v29, %v166_v30 }
 0x198   :  { %v173_v33 = vpack.c.bf16 %v172_v32, %v171_v31 }
 0x19a   :  { %1981 = vmatmul.mubr.msk.bf16.vlgmr.msra.gmra.mrb[0].mxu1 %vm133_vm0, %v173_v33 }
 0x19b   :  { %1986 = vmatprep.mubr.msk.bf16.mxu1 %vm2444_vm1, %v2443_v15 }
 0x26d   :  { %v231_v35 = vpop.f32.mrb[0].mxu1 }
 0x26e   :  { %v1982_v36 = vpop.f32.mrb[1].mxu1  ;;  %v232_v38 = vadd.f32 %v1864_v34, %v231_v35 }
 0x26f   :  { %v234_v37 = vpop.f32.mrb[2].mxu1 }
 0x270   :  { %v235_v39 = vadd.f32 %v1864_v34, %v234_v37  ;;  %v1983_v40 = vpop.f32.mrb[3].mxu1 }
 0x272   :  { %v2647_v41 = vpack.c.bf16 %v235_v39, %v232_v38 }
 0x274   :  { %240 = vrot.lane.b32.xlu0 %v2647_v41, %s2445_s4 }
 0x278   :  { %367 = vrot.lane.b32.xlu0 %v2647_v41, %s2446_s30 }
 0x27c   :  { %365 = vrot.lane.b32.xlu0 %v2647_v41, %s2447_s19 }
 0x280   :  { %492 = vrot.lane.b32.xlu0 %v2647_v41, %s2448_s20 }
 0x284   :  { %617 = vrot.lane.b32.xlu0 %v2647_v41, %s2449_s21 }
 0x2e6   :  { %v241_v42 = vpop.permute.xlu0 %240 }
 0x2e7   :  { %v247_v43 = vsel %vm242_vm2, %v241_v42, 0 }
 0x2e8   :  { %1985 = vmatpush3.bf16.xpose.msra.mxu1 %v247_v43 }
 0x2e9   :  { %1990 = vmatprep.subr.bf16.mxu1 %v2443_v15 }
 0x2ea   :  { %v368_v8 = vpop.permute.xlu0 %367 }
 0x2eb   :  { %v373_v14 = vsel %vm242_vm2, %v368_v8, 0 }
 0x2ee   :  { %v366_v13 = vpop.permute.xlu0 %365 }
 0x2ef   :  { %1987 = vmatmul.mubr.msk.bf16.vlgmr.msra.gmra.mrb[4].mxu1 %vm242_vm2, %v2647_v41 }
 0x2f0   :  { %1992 = vmatprep.mubr.msk.bf16.mxu1 %vm2444_vm1, %v2443_v15 }
 0x2f2   :  { %v493_v16 = vpop.permute.xlu0 %492 }
 0x2f3   :  { %v498_v17 = vsel %vm242_vm2, %v493_v16, 0 }
 0x2f6   :  { %v618_v18 = vpop.permute.xlu0 %617 }
 0x2f7   :  { %v623_v20 = vsel %vm242_vm2, %v618_v18, 0 }
 0x3c2   :  { %v283_v44 = vpop.f32.mrb[4].mxu1 }
 0x3c3   :  { %v290_v46 = vmul.f32 0.35355338, %v283_v44  ;;  %v1988_v47 = vpop.f32.mrb[5].mxu1 }
 0x3c4   :  { %v286_v48 = vpop.f32.mrb[6].mxu1 }
 0x3c5   :  { %v291_v50 = vmul.f32 0.35355338, %v286_v48  ;;  %v1989_v51 = vpop.f32.mrb[7].mxu1  ;;  %v292_v52 = vadd.f32 %v290_v46, %v2668_v45 }
 0x3c7   :  { %v295_v53 = vsel %vm294_vm3, %v292_v52, -inf  ;;  %v293_v54 = vadd.f32 %v291_v50, %v2673_v49 }
 0x3c8   :  { %296 = vmax.xlane.f32.xlu1 %v295_v53 }
 0x3c9   :  { %v298_v55 = vsel %vm294_vm3, %v293_v54, -inf }
 0x3cc   :  { %299 = vmax.xlane.f32.xlu1 %v298_v55 }
 0x455   :  { %v297_v56 = vpop.xlane.xlu1 %296 }
 0x456   :  { %v301_v57 = vsub.f32 %v292_v52, %v297_v56 }
 0x458   :  { %v303_v58 = vmul.f32 1.442695, %v301_v57 }
 0x459   :  { %v300_v59 = vpop.xlane.xlu1 %299 }
 0x45a   :  { %2218 = vpow2.f32 %v303_v58  ;;  %v302_v60 = vsub.f32 %v293_v54, %v300_v59 }
 0x45c   :  { %v305_v61 = vmul.f32 1.442695, %v302_v60 }
 0x45e   :  { %2220 = vpow2.f32 %v305_v61 }
 0x464   :  { %v2219_v62 = vpop.eup %2218 }
 0x465   :  { %v307_v63 = vsel %vm294_vm3, %v2219_v62, 0.0 }
 0x466   :  { %308 = vadd.xlane.f32.xlu1 %v307_v63 }
 0x468   :  { %v2221_v2 = vpop.eup %2220 }
 0x469   :  { %v310_v3 = vsel %vm294_vm3, %v2221_v2, 0.0 }
 0x46a   :  { %311 = vadd.xlane.f32.xlu1 %v310_v3 }
 0x47b   :  { %318 = vrot.lane.b32.xlu1 %v2647_v41, %s2436_s15  ;;  %s2452_s15 = smov 48  }
 0x47f   :  { %490 = vrot.lane.b32.xlu1 %v2647_v41, %s2450_s2 }
 0x483   :  { %615 = vrot.lane.b32.xlu1 %v2647_v41, %s2451_s26 }
 0x4f3   :  { %v309_v4 = vpop.xlane.xlu1 %308 }
 0x4f4   :  { %2222 = vrcp.f32 %v309_v4 }
 0x4f7   :  { %v312_v5 = vpop.xlane.xlu1 %311 }
 0x4f8   :  { %2224 = vrcp.f32 %v312_v5 }
 0x4fb   :  { %v319_v6 = vpop.permute.xlu1 %318 }
 0x4fc   :  { %1991 = vmatpush3.bf16.msra.mxu1 %v319_v6 }
 0x4fd   :  { %1996 = vmatprep.subr.bf16.mxu1 %v2443_v15 }
 0x4fe   :  { %v2223_v7 = vpop.eup %2222 }
 0x4ff   :  { %v315_v10 = vmul.f32 %v2223_v7, %v2219_v62  ;;  %v491_v19 = vpop.permute.xlu1 %490 }
 0x502   :  { %v2225_v9 = vpop.eup %2224 }
 0x503   :  { %v316_v11 = vmul.f32 %v2225_v9, %v2221_v2  ;;  %v616_v21 = vpop.permute.xlu1 %615 }
 0x505   :  { %v317_v12 = vpack.c.bf16 %v316_v11, %v315_v10 }
 0x507   :  { %1993 = vmatmul.mubr.msk.bf16.vlgmr.msra.gmra.mrb[8].mxu1 %vm294_vm3, %v317_v12 }
 0x508   :  { %1997 = vmatpush3.bf16.xpose.msra.mxu1 %v373_v14  ;;  %1998 = vmatprep.mubr.msk.bf16.mxu1 %vm2444_vm1, %v2443_v15 }
 0x509   :  { %2008 = vmatprep.subr.bf16.mxu1 %v2443_v15 }
 0x50f   :  { %1999 = vmatmul.mubr.msk.bf16.vlgmr.msra.gmra.mrb[12].mxu1 %vm242_vm2, %v366_v13 }
 0x510   :  { %2009 = vmatpush3.bf16.xpose.msra.mxu1 %v498_v17  ;;  %2010 = vmatprep.mubr.msk.bf16.mxu1 %vm2444_vm1, %v2443_v15 }
 0x511   :  { %2020 = vmatprep.subr.bf16.mxu1 %v2443_v15 }
 0x517   :  { %2011 = vmatmul.mubr.msk.bf16.vlgmr.msra.gmra.mrb[16].mxu1 %vm242_vm2, %v491_v19 }
 0x518   :  { %2021 = vmatpush3.bf16.xpose.msra.mxu1 %v623_v20  ;;  %2022 = vmatprep.mubr.msk.bf16.mxu1 %vm2444_vm1, %v2443_v15 }
 0x519   :  { %2032 = vmatprep.subr.bf16.mxu1 %v2443_v15 }
 0x51f   :  { %2023 = vmatmul.mubr.msk.bf16.vlgmr.msra.gmra.mrb[20].mxu1 %vm242_vm2, %v616_v21 }
 0x520   :  { %2036 = vmatprep.mubr.msk.bf16.mxu1 %vm2444_vm1, %v2443_v15 }
 0x5da   :  { %v2706_v22 = vpop.f32.mrb[8].mxu1 }
 0x5db   :  { %v1994_v23 = vpop.f32.mrb[9].mxu1 }
 0x5dc   :  { %v2708_v24 = vpop.f32.mrb[10].mxu1 }
 0x5dd   :  { %v1995_v25 = vpop.f32.mrb[11].mxu1 }
 0x5e2   :  { %v409_v26 = vpop.f32.mrb[12].mxu1 }
 0x5e3   :  { %v416_v27 = vmul.f32 0.35355338, %v409_v26  ;;  %v2000_v28 = vpop.f32.mrb[13].mxu1 }
 0x5e4   :  { %v412_v29 = vpop.f32.mrb[14].mxu1 }
 0x5e5   :  { %v417_v30 = vmul.f32 0.35355338, %v412_v29  ;;  %v2001_v31 = vpop.f32.mrb[15].mxu1  ;;  %v418_v32 = vadd.f32 %v416_v27, %v2668_v45 }
 0x5e7   :  { %v420_v33 = vsel %vm294_vm3, %v418_v32, -inf  ;;  %v419_v34 = vadd.f32 %v417_v30, %v2673_v49 }
 0x5e8   :  { %421 = vmax.xlane.f32.xlu0 %v420_v33 }
 0x5e9   :  { %v423_v35 = vsel %vm294_vm3, %v419_v34, -inf }
 0x5ea   :  { %424 = vmax.xlane.f32.xlu1 %v423_v35  ;;  %v534_v36 = vpop.f32.mrb[16].mxu1 }
 0x5eb   :  { %v541_v37 = vmul.f32 0.35355338, %v534_v36  ;;  %v2012_v38 = vpop.f32.mrb[17].mxu1 }
 0x5ec   :  { %v537_v39 = vpop.f32.mrb[18].mxu1 }
 0x5ed   :  { %v542_v40 = vmul.f32 0.35355338, %v537_v39  ;;  %v2013_v42 = vpop.f32.mrb[19].mxu1  ;;  %v543_v43 = vadd.f32 %v541_v37, %v2668_v45 }
 0x5ef   :  { %v545_v44 = vsel %vm294_vm3, %v543_v43, -inf  ;;  %v544_v46 = vadd.f32 %v542_v40, %v2673_v49 }
 0x5f0   :  { %546 = vmax.xlane.f32.xlu0 %v545_v44 }
 0x5f1   :  { %v548_v51 = vsel %vm294_vm3, %v544_v46, -inf }
 0x5f2   :  { %v659_v47 = vpop.f32.mrb[20].mxu1 }
 0x5f3   :  { %v666_v48 = vmul.f32 0.35355338, %v659_v47  ;;  %v2024_v50 = vpop.f32.mrb[21].mxu1 }
 0x5f4   :  { %549 = vmax.xlane.f32.xlu0 %v548_v51  ;;  %v662_v52 = vpop.f32.mrb[22].mxu1 }
 0x5f5   :  { %v667_v53 = vmul.f32 0.35355338, %v662_v52  ;;  %v2025_v54 = vpop.f32.mrb[23].mxu1  ;;  %v668_v55 = vadd.f32 %v666_v48, %v2668_v45 }
 0x5f7   :  { %v670_v56 = vsel %vm294_vm3, %v668_v55, -inf  ;;  %v669_v57 = vadd.f32 %v667_v53, %v2673_v49 }
 0x5f8   :  { %671 = vmax.xlane.f32.xlu0 %v670_v56 }
 0x5f9   :  { %v673_v58 = vsel %vm294_vm3, %v669_v57, -inf }
 0x5fa   :  { %674 = vmax.xlane.f32.xlu1 %v673_v58 }
 0x675   :  { %v422_v59 = vpop.xlane.xlu0 %421 }
 0x676   :  { %v426_v60 = vsub.f32 %v418_v32, %v422_v59 }
 0x677   :  { %v425_v61 = vpop.xlane.xlu1 %424 }
 0x678   :  { %v428_v62 = vmul.f32 1.442695, %v426_v60  ;;  %v427_v63 = vsub.f32 %v419_v34, %v425_v61 }
 0x67a   :  { %2226 = vpow2.f32 %v428_v62  ;;  %v430_v2 = vmul.f32 1.442695, %v427_v63 }
 0x67c   :  { %2228 = vpow2.f32 %v430_v2 }
 0x67d   :  { %v547_v3 = vpop.xlane.xlu0 %546 }
 0x67e   :  { %v551_v4 = vsub.f32 %v543_v43, %v547_v3  ;;  %v2197_v3 = vld [vmem:[#allocation7 + $0x8] sm:$0xff]  }
 0x680   :  { %v553_v5 = vmul.f32 1.442695, %v551_v4 }
 0x681   :  { %v550_v45 = vpop.xlane.xlu0 %549 }
 0x682   :  { %2230 = vpow2.f32 %v553_v5  ;;  %v552_v6 = vsub.f32 %v544_v46, %v550_v45 }
 0x684   :  { %v2227_v7 = vpop.eup %2226  ;;  %v555_v49 = vmul.f32 1.442695, %v552_v6 }
 0x685   :  { %v672_v8 = vpop.xlane.xlu0 %671  ;;  %v432_v9 = vsel %vm294_vm3, %v2227_v7, 0.0 }
 0x686   :  { %v2229_v10 = vpop.eup %2228  ;;  %2232 = vpow2.f32 %v555_v49  ;;  %v676_v11 = vsub.f32 %v668_v55, %v672_v8  ;;  %433 = vadd.xlane.f32.xlu0 %v432_v9 }
 0x687   :  { %v435_v12 = vsel %vm294_vm3, %v2229_v10, 0.0  ;;  %v675_v21 = vpop.xlane.xlu1 %674 }
 0x688   :  { %v678_v13 = vmul.f32 1.442695, %v676_v11  ;;  %436 = vadd.xlane.f32.xlu1 %v435_v12  ;;  %v677_v23 = vsub.f32 %v669_v57, %v675_v21  ;;  %v2196_v57 = vld [vmem:[#allocation7] sm:$0xff]  }
 0x689   :  { %2033 = vmatpush3.bf16.msra.mxu1 %v2196_v57 }
 0x68a   :  { %2234 = vpow2.f32 %v678_v13  ;;  %v680_v25 = vmul.f32 1.442695, %v677_v23  ;;  %2034 = vmatprep.subr.bf16.mxu1 %v2443_v15 }
 0x68c   :  { %v2231_v14 = vpop.eup %2230  ;;  %2236 = vpow2.f32 %v680_v25 }
 0x68d   :  { %v557_v16 = vsel %vm294_vm3, %v2231_v14, 0.0  ;;  %2035 = vmatpush3.bf16.msra.mxu1 %v2197_v3 }
 0x68e   :  { %558 = vadd.xlane.f32.xlu0 %v557_v16  ;;  %2048 = vmatprep.subr.bf16.mxu1 %v2443_v15 }
 0x690   :  { %v2233_v17 = vpop.eup %2232 }
 0x691   :  { %v560_v18 = vsel %vm294_vm3, %v2233_v17, 0.0 }
 0x692   :  { %561 = vadd.xlane.f32.xlu1 %v560_v18 }
 0x694   :  { %v2235_v19 = vpop.eup %2234 }
 0x695   :  { %v682_v20 = vsel %vm294_vm3, %v2235_v19, 0.0 }
 0x696   :  { %683 = vadd.xlane.f32.xlu0 %v682_v20  ;;  %v2237_v26 = vpop.eup %2236 }
 0x697   :  { %v685_v27 = vsel %vm294_vm3, %v2237_v26, 0.0 }
 0x6a3   :  { %568 = vrot.lane.b32.xlu1 %v2647_v41, %s2452_s15 }
 0x6ac   :  { %443 = vrot.lane.b32.xlu0 %v2647_v41, %s2453_s27 }
 0x6c7   :  { %686 = vadd.xlane.f32.xlu1 %v685_v27 }
 0x6d8   :  { %693 = vrot.lane.b32.xlu1 %v2647_v41, %s2454_s28 }
 0x713   :  { %v434_v29 = vpop.xlane.xlu0 %433 }
 0x715   :  { %v437_v28 = vpop.xlane.xlu1 %436 }
 0x716   :  { %2238 = vrcp.f32 %v437_v28 }
 0x717   :  { %2240 = vrcp.f32 %v434_v29 }
 0x71b   :  { %v559_v30 = vpop.xlane.xlu0 %558 }
 0x71f   :  { %v562_v31 = vpop.xlane.xlu1 %561 }
 0x720   :  { %2242 = vrcp.f32 %v562_v31  ;;  %v2239_v32 = vpop.eup %2238 }
 0x721   :  { %2244 = vrcp.f32 %v559_v30  ;;  %v2241_v34 = vpop.eup %2240  ;;  %v441_v35 = vmul.f32 %v2239_v32, %v2229_v10 }
 0x722   :  { %v440_v37 = vmul.f32 %v2241_v34, %v2227_v7 }
 0x723   :  { %v684_v33 = vpop.xlane.xlu0 %683  ;;  %v569_v41 = vpop.permute.xlu1 %568 }
 0x724   :  { %v442_v38 = vpack.c.bf16 %v441_v35, %v440_v37  ;;  %2246 = vrcp.f32 %v684_v33 }
 0x727   :  { %v444_v36 = vpop.permute.xlu0 %443 }
 0x728   :  { %2003 = vmatpush3.bf16.msra.mxu0 %v444_v36 }
 0x729   :  { %2014 = vmatprep.subr.bf16.mxu0 %v2443_v15 }
 0x72a   :  { %v2243_v39 = vpop.eup %2242 }
 0x72b   :  { %2005 = vmatmul.mubr.msk.bf16.vlgmr.msra.gmra.mrb[0].mxu0 %vm294_vm3, %v442_v38  ;;  %v2245_v40 = vpop.eup %2244  ;;  %v566_v42 = vmul.f32 %v2243_v39, %v2233_v17 }
 0x72c   :  { %2015 = vmatpush3.bf16.msra.mxu0 %v569_v41  ;;  %2016 = vmatprep.mubr.msk.bf16.mxu0 %vm2444_vm1, %v2443_v15  ;;  %v565_v43 = vmul.f32 %v2245_v40, %v2231_v14 }
 0x72d   :  { %2026 = vmatprep.subr.bf16.mxu0 %v2443_v15 }
 0x72e   :  { %v567_v44 = vpack.c.bf16 %v566_v42, %v565_v43  ;;  %v2247_v48 = vpop.eup %2246  ;;  %v2198_v43 = vld [vmem:[#allocation5] sm:$0xff]  }
 0x72f   :  { %v690_v51 = vmul.f32 %v2247_v48, %v2235_v19 }
 0x733   :  { %2017 = vmatmul.mubr.msk.bf16.vlgmr.msra.gmra.mrb[4].mxu0 %vm294_vm3, %v567_v44  ;;  %v2199_v44 = vld [vmem:[#allocation5 + $0x8] sm:$0xff]  }
 0x734   :  { %2028 = vmatprep.mubr.msk.bf16.mxu0 %vm2444_vm1, %v2443_v15 }
 0x754   :  { %v687_v46 = vpop.xlane.xlu1 %686 }
 0x755   :  { %2248 = vrcp.f32 %v687_v46  ;;  %v113_v46 = vld [vmem:[%s2966_s1] sm:$0xff] }
 0x758   :  { %v694_v47 = vpop.permute.xlu1 %693 }
 0x759   :  { %2027 = vmatpush3.bf16.msra.mxu0 %v694_v47  ;;  %v114_v47 = vld [vmem:[%s2966_s1 + $0x8] sm:$0xff] }
 0x75a   :  { %2040 = vmatprep.subr.bf16.mxu0 %v2443_v15  ;;  %v115_v48 = vpack.c.bf16 %v114_v47, %v113_v46 }
 0x75f   :  { %v2249_v50 = vpop.eup %2248 }
 0x760   :  { %v691_v52 = vmul.f32 %v2249_v50, %v2237_v26  ;;  %v2200_v50 = vld [vmem:[#allocation2] sm:$0xff]  }
 0x762   :  { %v692_v53 = vpack.c.bf16 %v691_v52, %v690_v51  ;;  %v2201_v51 = vld [vmem:[#allocation2 + $0x8] sm:$0xff]  }
 0x764   :  { %2029 = vmatmul.mubr.msk.bf16.vlgmr.msra.gmra.mrb[8].mxu0 %vm294_vm3, %v692_v53 }
 0x765   :  { %2044 = vmatprep.mubr.msk.bf16.mxu0 %vm2444_vm1, %v2443_v15  ;;  %2041 = vmatpush3.bf16.msra.mxu0 %v2200_v50 }
 0x766   :  { %2042 = vmatprep.subr.bf16.mxu0 %v2443_v15 }
 0x769   :  { %2043 = vmatpush3.bf16.msra.mxu0 %v2201_v51 }
 0x76a   :  { %2056 = vmatprep.subr.bf16.mxu0 %v2443_v15 }
 0x7fe   :  { %v483_v54 = vpop.f32.mrb[0].mxu0 }
 0x7ff   :  { %v2006_v55 = vpop.f32.mrb[1].mxu0 }
 0x800   :  { %v486_v56 = vpop.f32.mrb[2].mxu0 }
 0x801   :  { %v2164_v58 = vpack.i.bf16 %v486_v56, %v483_v54  ;;  %v2007_v59 = vpop.f32.mrb[3].mxu0 }
 0x803   :  { %2165 = vrot.lane.b32.xlu1 %v2164_v58, %s2442_s16 }
 0x806   :  { %v608_v60 = vpop.f32.mrb[4].mxu0 }
 0x807   :  { %v2018_v61 = vpop.f32.mrb[5].mxu0 }
 0x808   :  { %v611_v62 = vpop.f32.mrb[6].mxu0 }
 0x809   :  { %v2169_v63 = vpack.i.bf16 %v611_v62, %v608_v60  ;;  %v2019_v2 = vpop.f32.mrb[7].mxu0  ;;  %v1880_v60 = vld [vmem:[#allocation10 + $0x2] ss:$0 sm:$0xff] }
 0x80a   :  { %v1881_v2 = vld [vmem:[#allocation10 + $0x3] ss:$0 sm:$0xff] }
 0x80b   :  { %2170 = vrot.lane.b32.xlu0 %v2169_v63, %s2455_s14 }
 0x837   :  { %v733_v4 = vpop.f32.mrb[8].mxu0 }
 0x838   :  { %v2030_v5 = vpop.f32.mrb[9].mxu0 }
 0x839   :  { %v736_v45 = vpop.f32.mrb[10].mxu0 }
 0x83a   :  { %v2174_v6 = vpack.i.bf16 %v736_v45, %v733_v4  ;;  %v2031_v7 = vpop.f32.mrb[11].mxu0 }
 0x83c   :  { %2175 = vrot.lane.b32.xlu1 %v2174_v6, %s2456_s6  ;;  %v1886_v6 = vld [vmem:[#allocation10 + $0x8] ss:$0 sm:$0xff] }
 0x875   :  { %v2166_v49 = vpop.permute.xlu1 %2165 }
 0x876   :  { %v2168_v9 = vunpack.i.h.bf16 %v2166_v49  ;;  %v2167_v10 = vunpack.i.l.bf16 %v2166_v49 }
 0x878   :  { %v765_v14 = vsel %vm242_vm2, %v2708_v24, %v2168_v9  ;;  %v764_v16 = vsel %vm242_vm2, %v2706_v22, %v2167_v10  ;;  %v1879_v24 = vld [vmem:[#allocation10 + $0x9] ss:$0 sm:$0xff] }
 0x87d   :  { %v2171_v8 = vpop.permute.xlu0 %2170 }
 0x87e   :  { %v2173_v11 = vunpack.i.h.bf16 %v2171_v8  ;;  %v2172_v12 = vunpack.i.l.bf16 %v2171_v8 }
 0x880   :  { %v766_v19 = vsel %vm294_vm3, %v764_v16, %v2172_v12  ;;  %v767_v20 = vsel %vm294_vm3, %v765_v14, %v2173_v11  ;;  %v1882_v14 = vld [vmem:[#allocation10 + $0x7] ss:$0 sm:$0xff] }
 0x8ae   :  { %v2176_v13 = vpop.permute.xlu1 %2175 }
 0x8af   :  { %v2178_v17 = vunpack.i.h.bf16 %v2176_v13  ;;  %v2177_v18 = vunpack.i.l.bf16 %v2176_v13 }
 0x8b1   :  { %v769_v21 = vsel %vm768_vm4, %v766_v19, %v2177_v18  ;;  %v770_v23 = vsel %vm768_vm4, %v767_v20, %v2178_v17 }
 0x8b2   :  { %v771_v25 = vpack.c.bf16 %v770_v23, %v769_v21 }
 0x8b4   :  { %2037 = vmatmul.mubr.msk.bf16.vlgmr.msra.gmra.mrb[24].mxu1 %vm133_vm0, %v771_v25 }
 0x8b5   :  { %2052 = vmatprep.mubr.msk.bf16.mxu1 %vm2444_vm1, %v2443_v15  ;;  %2049 = vmatpush3.bf16.msra.mxu1 %v2198_v43 }
 0x8b6   :  { %2050 = vmatprep.subr.bf16.mxu1 %v2443_v15 }
 0x8b9   :  { %2051 = vmatpush3.bf16.msra.mxu1 %v2199_v44 }
 0x8ba   :  { %2062 = vmatprep.subr.bf16.mxu1 %v2443_v15 }
 0x8bc   :  { %2053 = vmatmul.mubr.msk.bf16.vlgmr.msra.gmra.mrb[28].mxu1 %vm133_vm0, %v115_v48 }
 0x8bd   :  { %2064 = vmatprep.mubr.msk.bf16.mxu1 %vm2444_vm1, %v2443_v15 }
 0x987   :  { %v825_v26 = vpop.f32.mrb[24].mxu1 }
 0x988   :  { %v832_v22 = vadd.f32 %v825_v26, %v2615_v0  ;;  %v2038_v27 = vpop.f32.mrb[25].mxu1 }
 0x989   :  { %v828_v28 = vpop.f32.mrb[26].mxu1 }
 0x98a   :  { %v2760_v29 = vadd.f32 %v1879_v24, %v832_v22  ;;  %v833_v30 = vadd.f32 %v828_v28, %v2620_v1  ;;  %v2039_v31 = vpop.f32.mrb[27].mxu1 }
 0x98c   :  { %v2763_v32 = vadd.f32 %v1879_v24, %v833_v30  ;;  %v840_v33 = vsel %vm133_vm0, %v2760_v29, 0.0 }
 0x98d   :  { %841 = vadd.xlane.f32.xlu0 %v840_v33 }
 0x98e   :  { %v843_v34 = vsel %vm133_vm0, %v2763_v32, 0.0 }
 0x98f   :  { %844 = vadd.xlane.f32.xlu1 %v843_v34  ;;  %v1001_v7 = vpop.f32.mrb[28].mxu1 }
 0x990   :  { %v1002_v49 = vadd.f32 %v1886_v6, %v1001_v7  ;;  %v2054_v8 = vpop.f32.mrb[29].mxu1 }
 0x991   :  { %v1004_v9 = vpop.f32.mrb[30].mxu1 }
 0x992   :  { %v1005_v10 = vadd.f32 %v1886_v6, %v1004_v9  ;;  %v2055_v11 = vpop.f32.mrb[31].mxu1 }
 0x994   :  { %v2789_v12 = vpack.c.bf16 %v1005_v10, %v1002_v49 }
 0x996   :  { %v1013_v13 = vsel %vm242_vm2, %v2789_v12, 0 }
 0xa1a   :  { %v842_v35 = vpop.xlane.xlu0 %841 }
 0xa1b   :  { %v846_v36 = vmul.f32 0.03125, %v842_v35  ;;  %v118_v35 = vld [vmem:[%s2968_s3] sm:$0xff] }
 0xa1c   :  { %v845_v0 = vpop.xlane.xlu1 %844 }
 0xa1d   :  { %v848_v37 = vsub.f32 %v2760_v29, %v846_v36  ;;  %v847_v38 = vmul.f32 0.03125, %v845_v0 }
 0xa1f   :  { %v849_v39 = vsub.f32 %v2763_v32, %v847_v38  ;;  %v850_v1 = vmul.f32 %v848_v37, %v848_v37  ;;  %v119_v38 = vld [vmem:[%s2968_s3 + $0x8] sm:$0xff] }
 0xa21   :  { %v852_v41 = vsel %vm133_vm0, %v850_v1, 0.0  ;;  %v851_v40 = vmul.f32 %v849_v39, %v849_v39 }
 0xa22   :  { %853 = vadd.xlane.f32.xlu0 %v852_v41 }
 0xa23   :  { %v855_v42 = vsel %vm133_vm0, %v851_v40, 0.0 }
 0xa26   :  { %856 = vadd.xlane.f32.xlu0 %v855_v42 }
 0xa3c   :  { %1134 = vrot.lane.b32.xlu0 %v2789_v12, %s2447_s19 }
 0xa40   :  { %1384 = vrot.lane.b32.xlu0 %v2789_v12, %s2451_s26 }
 0xaaf   :  { %v854_v52 = vpop.xlane.xlu0 %853 }
 0xab0   :  { %v858_v53 = vmul.f32 0.03125, %v854_v52 }
 0xab2   :  { %v860_v54 = vadd.f32 1e-05, %v858_v53 }
 0xab3   :  { %v857_v55 = vpop.xlane.xlu0 %856 }
 0xab4   :  { %2250 = vrsqrt.f32 %v860_v54  ;;  %v859_v56 = vmul.f32 0.03125, %v857_v55 }
 0xab6   :  { %v861_v57 = vadd.f32 1e-05, %v859_v56 }
 0xab7   :  { %v1135_v23 = vpop.permute.xlu0 %1134 }
 0xab8   :  { %2252 = vrsqrt.f32 %v861_v57  ;;  %v1140_v24 = vsel %vm242_vm2, %v1135_v23, 0 }
 0xabb   :  { %v1385_v28 = vpop.permute.xlu0 %1384 }
 0xabc   :  { %v1390_v31 = vsel %vm242_vm2, %v1385_v28, 0 }
 0xabe   :  { %v2251_v58 = vpop.eup %2250 }
 0xabf   :  { %v864_v59 = vmul.f32 %v2251_v58, %v848_v37 }
 0xac1   :  { %v870_v62 = vmul.f32 %v1880_v60, %v864_v59 }
 0xac2   :  { %v2253_v61 = vpop.eup %2252 }
 0xac3   :  { %v865_v63 = vmul.f32 %v2253_v61, %v849_v39  ;;  %v876_v4 = vadd.f32 %v1881_v2, %v870_v62 }
 0xac5   :  { %v871_v3 = vmul.f32 %v1880_v60, %v865_v63 }
 0xac7   :  { %v877_v5 = vadd.f32 %v1881_v2, %v871_v3 }
 0xac9   :  { %v878_v45 = vpack.c.bf16 %v877_v5, %v876_v4 }
 0xacb   :  { %2045 = vmatmul.mubr.msk.bf16.vlgmr.msra.gmra.mrb[12].mxu0 %vm133_vm0, %v878_v45 }
 0xacc   :  { %2058 = vmatprep.mubr.msk.bf16.mxu0 %vm2444_vm1, %v2443_v15  ;;  %2057 = vmatpush3.bf16.xpose.msra.mxu0 %v1013_v13 }
 0xacd   :  { %2068 = vmatprep.subr.bf16.mxu0 %v2443_v15 }
 0xb9e   :  { %v936_v16 = vpop.f32.mrb[12].mxu0 }
 0xb9f   :  { %v2046_v17 = vpop.f32.mrb[13].mxu0  ;;  %v937_v19 = vadd.f32 %v1882_v14, %v936_v16 }
 0xba0   :  { %v939_v18 = vpop.f32.mrb[14].mxu0 }
 0xba1   :  { %v940_v20 = vadd.f32 %v1882_v14, %v939_v18  ;;  %v2047_v21 = vpop.f32.mrb[15].mxu0 }
 0xba3   :  { %v943_v25 = vpack.c.bf16 %v940_v20, %v937_v19 }
 0xba5   :  { %1132 = vrot.lane.b32.xlu1 %v943_v25, %s2447_s19  ;;  %2059 = vmatmul.mubr.msk.bf16.vlgmr.msra.gmra.mrb[16].mxu0 %vm242_vm2, %v943_v25 }
 0xba6   :  { %2069 = vmatpush3.bf16.xpose.msra.mxu0 %v1140_v24  ;;  %2070 = vmatprep.mubr.msk.bf16.mxu0 %vm2444_vm1, %v2443_v15 }
 0xba7   :  { %2080 = vmatprep.subr.bf16.mxu0 %v2443_v15 }
 0xba9   :  { %1259 = vrot.lane.b32.xlu1 %v2789_v12, %s2450_s2 }
 0xbad   :  { %1257 = vrot.lane.b32.xlu1 %v943_v25, %s2450_s2 }
 0xbb1   :  { %1382 = vrot.lane.b32.xlu1 %v943_v25, %s2451_s26 }
 0xc17   :  { %v1133_v26 = vpop.permute.xlu1 %1132 }
 0xc18   :  { %2071 = vmatmul.mubr.msk.bf16.vlgmr.msra.gmra.mrb[20].mxu0 %vm242_vm2, %v1133_v26 }
 0xc19   :  { %2082 = vmatprep.mubr.msk.bf16.mxu0 %vm2444_vm1, %v2443_v15 }
 0xc1b   :  { %v1260_v22 = vpop.permute.xlu1 %1259 }
 0xc1c   :  { %v1265_v27 = vsel %vm242_vm2, %v1260_v22, 0 }
 0xc1d   :  { %2081 = vmatpush3.bf16.xpose.msra.mxu0 %v1265_v27 }
 0xc1e   :  { %2092 = vmatprep.subr.bf16.mxu0 %v2443_v15 }
 0xc1f   :  { %v1258_v30 = vpop.permute.xlu1 %1257 }
 0xc23   :  { %v1383_v33 = vpop.permute.xlu1 %1382 }
 0xc24   :  { %2083 = vmatmul.mubr.msk.bf16.vlgmr.msra.gmra.mrb[24].mxu0 %vm242_vm2, %v1258_v30 }
 0xc25   :  { %2093 = vmatpush3.bf16.xpose.msra.mxu0 %v1390_v31  ;;  %2094 = vmatprep.mubr.msk.bf16.mxu0 %vm2444_vm1, %v2443_v15 }
 0xc26   :  { %2104 = vmatprep.subr.bf16.mxu0 %v2443_v15 }
 0xc2c   :  { %2095 = vmatmul.mubr.msk.bf16.vlgmr.msra.gmra.mrb[28].mxu0 %vm242_vm2, %v1383_v33 }
 0xc2d   :  { %2108 = vmatprep.mubr.msk.bf16.mxu0 %vm2444_vm1, %v2443_v15 }
 0xc78   :  { %v1049_v34 = vpop.f32.mrb[16].mxu0 }
 0xc79   :  { %v1056_v36 = vmul.f32 0.35355338, %v1049_v34  ;;  %v2060_v0 = vpop.f32.mrb[17].mxu0 }
 0xc7a   :  { %v1052_v37 = vpop.f32.mrb[18].mxu0 }
 0xc7b   :  { %v1057_v39 = vmul.f32 0.35355338, %v1052_v37  ;;  %v2061_v1 = vpop.f32.mrb[19].mxu0  ;;  %v1058_v41 = vadd.f32 %v1056_v36, %v118_v35 }
 0xc7d   :  { %v1060_v40 = vsel %vm294_vm3, %v1058_v41, -inf  ;;  %v1059_v42 = vadd.f32 %v1057_v39, %v119_v38 }
 0xc7e   :  { %1061 = vmax.xlane.f32.xlu0 %v1060_v40 }
 0xc7f   :  { %v1063_v43 = vsel %vm294_vm3, %v1059_v42, -inf }
 0xc80   :  { %1064 = vmax.xlane.f32.xlu1 %v1063_v43 }
 0xceb   :  { %v1176_v44 = vpop.f32.mrb[20].mxu0 }
 0xcec   :  { %v1183_v46 = vmul.f32 0.35355338, %v1176_v44  ;;  %v2072_v47 = vpop.f32.mrb[21].mxu0 }
 0xced   :  { %v1179_v48 = vpop.f32.mrb[22].mxu0 }
 0xcee   :  { %v1184_v50 = vmul.f32 0.35355338, %v1179_v48  ;;  %v2073_v51 = vpop.f32.mrb[23].mxu0  ;;  %v1185_v52 = vadd.f32 %v1183_v46, %v118_v35 }
 0xcf0   :  { %v1187_v53 = vsel %vm294_vm3, %v1185_v52, -inf  ;;  %v1186_v54 = vadd.f32 %v1184_v50, %v119_v38 }
 0xcf1   :  { %1188 = vmax.xlane.f32.xlu0 %v1187_v53 }
 0xcf2   :  { %v1190_v55 = vsel %vm294_vm3, %v1186_v54, -inf }
 0xcf5   :  { %1191 = vmax.xlane.f32.xlu0 %v1190_v55 }
 0xcf7   :  { %v1301_v56 = vpop.f32.mrb[24].mxu0 }
 0xcf8   :  { %v1308_v57 = vmul.f32 0.35355338, %v1301_v56  ;;  %v2084_v58 = vpop.f32.mrb[25].mxu0 }
 0xcf9   :  { %v1304_v59 = vpop.f32.mrb[26].mxu0 }
 0xcfa   :  { %v1309_v60 = vmul.f32 0.35355338, %v1304_v59  ;;  %v2085_v61 = vpop.f32.mrb[27].mxu0  ;;  %v1310_v62 = vadd.f32 %v1308_v57, %v118_v35 }
 0xcfc   :  { %v1312_v63 = vsel %vm294_vm3, %v1310_v62, -inf  ;;  %v1311_v2 = vadd.f32 %v1309_v60, %v119_v38 }
 0xcfd   :  { %1313 = vmax.xlane.f32.xlu0 %v1312_v63 }
 0xcfe   :  { %v1315_v3 = vsel %vm294_vm3, %v1311_v2, -inf }
 0xcff   :  { %1316 = vmax.xlane.f32.xlu1 %v1315_v3  ;;  %v1426_v4 = vpop.f32.mrb[28].mxu0 }
 0xd00   :  { %v1433_v5 = vmul.f32 0.35355338, %v1426_v4  ;;  %v2096_v45 = vpop.f32.mrb[29].mxu0 }
 0xd01   :  { %v1429_v6 = vpop.f32.mrb[30].mxu0 }
 0xd02   :  { %v1434_v7 = vmul.f32 0.35355338, %v1429_v6  ;;  %v2097_v49 = vpop.f32.mrb[31].mxu0  ;;  %v1435_v8 = vadd.f32 %v1433_v5, %v118_v35 }
 0xd04   :  { %v1437_v9 = vsel %vm294_vm3, %v1435_v8, -inf  ;;  %v1436_v10 = vadd.f32 %v1434_v7, %v119_v38 }
 0xd05   :  { %1438 = vmax.xlane.f32.xlu0 %v1437_v9 }
 0xd06   :  { %v1440_v11 = vsel %vm294_vm3, %v1436_v10, -inf }
 0xd07   :  { %1441 = vmax.xlane.f32.xlu1 %v1440_v11 }
 0xd0b   :  { %v1062_v13 = vpop.xlane.xlu0 %1061 }
 0xd0c   :  { %v1066_v14 = vsub.f32 %v1058_v41, %v1062_v13 }
 0xd0d   :  { %v1065_v16 = vpop.xlane.xlu1 %1064 }
 0xd0e   :  { %v1068_v17 = vmul.f32 1.442695, %v1066_v14  ;;  %v1067_v18 = vsub.f32 %v1059_v42, %v1065_v16 }
 0xd10   :  { %2254 = vpow2.f32 %v1068_v17  ;;  %v1070_v19 = vmul.f32 1.442695, %v1067_v18 }
 0xd12   :  { %2256 = vpow2.f32 %v1070_v19 }
 0xd1a   :  { %v2835_v20 = vpop.eup %2254 }
 0xd1b   :  { %v1072_v21 = vsel %vm294_vm3, %v2835_v20, 0.0 }
 0xd1c   :  { %v2257_v23 = vpop.eup %2256  ;;  %1073 = vadd.xlane.f32.xlu0 %v1072_v21 }
 0xd1d   :  { %v1075_v25 = vsel %vm294_vm3, %v2257_v23, 0.0 }
 0xd1e   :  { %1076 = vadd.xlane.f32.xlu1 %v1075_v25 }
 0xd7e   :  { %v1189_v24 = vpop.xlane.xlu0 %1188 }
 0xd7f   :  { %v1193_v26 = vsub.f32 %v1185_v52, %v1189_v24 }
 0xd81   :  { %v1195_v22 = vmul.f32 1.442695, %v1193_v26 }
 0xd82   :  { %v1192_v27 = vpop.xlane.xlu0 %1191 }
 0xd83   :  { %2258 = vpow2.f32 %v1195_v22  ;;  %v1194_v28 = vsub.f32 %v1186_v54, %v1192_v27 }
 0xd85   :  { %v1197_v30 = vmul.f32 1.442695, %v1194_v28 }
 0xd87   :  { %2260 = vpow2.f32 %v1197_v30 }
 0xd8a   :  { %v1314_v31 = vpop.xlane.xlu0 %1313 }
 0xd8b   :  { %v1318_v33 = vsub.f32 %v1310_v62, %v1314_v31 }
 0xd8c   :  { %v1317_v34 = vpop.xlane.xlu1 %1316 }
 0xd8d   :  { %v2840_v35 = vpop.eup %2258  ;;  %v1320_v36 = vmul.f32 1.442695, %v1318_v33  ;;  %v1319_v0 = vsub.f32 %v1311_v2, %v1317_v34  ;;  %v2202_v34 = vld [vmem:[#allocation8] sm:$0xff]  }
 0xd8e   :  { %v1199_v37 = vsel %vm294_vm3, %v2840_v35, 0.0  ;;  %2105 = vmatpush3.bf16.msra.mxu0 %v2202_v34 }
 0xd8f   :  { %2262 = vpow2.f32 %v1320_v36  ;;  %v1322_v38 = vmul.f32 1.442695, %v1319_v0  ;;  %1200 = vadd.xlane.f32.xlu0 %v1199_v37  ;;  %2106 = vmatprep.subr.bf16.mxu0 %v2443_v15 }
 0xd91   :  { %v2261_v39 = vpop.eup %2260  ;;  %2264 = vpow2.f32 %v1322_v38 }
 0xd92   :  { %v1439_v1 = vpop.xlane.xlu0 %1438  ;;  %v1202_v41 = vsel %vm294_vm3, %v2261_v39, 0.0 }
 0xd93   :  { %v1443_v40 = vsub.f32 %v1435_v8, %v1439_v1  ;;  %1203 = vadd.xlane.f32.xlu1 %v1202_v41  ;;  %v2203_v41 = vld [vmem:[#allocation8 + $0x8] sm:$0xff]  }
 0xd94   :  { %v1442_v51 = vpop.xlane.xlu1 %1441  ;;  %2107 = vmatpush3.bf16.msra.mxu0 %v2203_v41  ;;  %v2207_v41 = vld [vmem:[%s2975_s10 + $0x8] sm:$0xff]  }
 0xd95   :  { %v1445_v42 = vmul.f32 1.442695, %v1443_v40  ;;  %v1444_v52 = vsub.f32 %v1436_v10, %v1442_v51  ;;  %2120 = vmatprep.subr.bf16.mxu0 %v2443_v15 }
 0xd97   :  { %2266 = vpow2.f32 %v1445_v42  ;;  %v1447_v53 = vmul.f32 1.442695, %v1444_v52 }
 0xd99   :  { %v2263_v43 = vpop.eup %2262  ;;  %2268 = vpow2.f32 %v1447_v53 }
 0xd9a   :  { %v1324_v44 = vsel %vm294_vm3, %v2263_v43, 0.0 }
 0xd9b   :  { %v2265_v46 = vpop.eup %2264  ;;  %1325 = vadd.xlane.f32.xlu0 %v1324_v44 }
 0xd9c   :  { %v1327_v47 = vsel %vm294_vm3, %v2265_v46, 0.0 }
 0xd9d   :  { %1328 = vadd.xlane.f32.xlu1 %v1327_v47 }
 0xda1   :  { %v2847_v48 = vpop.eup %2266 }
 0xda2   :  { %v1449_v50 = vsel %vm294_vm3, %v2847_v48, 0.0 }
 0xda3   :  { %1450 = vadd.xlane.f32.xlu0 %v1449_v50  ;;  %v2269_v54 = vpop.eup %2268 }
 0xda4   :  { %v1452_v55 = vsel %vm294_vm3, %v2269_v54, 0.0 }
 0xda9   :  { %v1074_v57 = vpop.xlane.xlu0 %1073 }
 0xdab   :  { %v1077_v56 = vpop.xlane.xlu1 %1076 }
 0xdac   :  { %2270 = vrcp.f32 %v1077_v56 }
 0xdad   :  { %2272 = vrcp.f32 %v1074_v57 }
 0xdae   :  { %1210 = vrot.lane.b32.xlu1 %v2789_v12, %s2446_s30 }
 0xdb2   :  { %1335 = vrot.lane.b32.xlu1 %v2789_v12, %s2448_s20 }
 0xdb6   :  { %v2271_v61 = vpop.eup %2270 }
 0xdb7   :  { %v2273_v63 = vpop.eup %2272  ;;  %v1081_v2 = vmul.f32 %v2271_v61, %v2257_v23 }
 0xdb8   :  { %v1080_v4 = vmul.f32 %v2273_v63, %v2835_v20 }
 0xdb9   :  { %1084 = vrot.lane.b32.xlu0 %v2789_v12, %s2445_s4 }
 0xdd6   :  { %1453 = vadd.xlane.f32.xlu1 %v1452_v55 }
 0xde7   :  { %1460 = vrot.lane.b32.xlu1 %v2789_v12, %s2449_s21  ;;  %v1082_v12 = vpack.c.bf16 %v1081_v2, %v1080_v4  ;;  %v1901_v2 = vld [vmem:[#allocation10 + $0xa] ss:$0 sm:$0xff] }
 0xe1c   :  { %v1201_v58 = vpop.xlane.xlu0 %1200 }
 0xe20   :  { %v1204_v59 = vpop.xlane.xlu1 %1203 }
 0xe21   :  { %2274 = vrcp.f32 %v1204_v59 }
 0xe22   :  { %2276 = vrcp.f32 %v1201_v58 }
 0xe28   :  { %v1326_v60 = vpop.xlane.xlu0 %1325 }
 0xe2a   :  { %v1329_v3 = vpop.xlane.xlu1 %1328 }
 0xe2b   :  { %2278 = vrcp.f32 %v1329_v3  ;;  %v2275_v45 = vpop.eup %2274 }
 0xe2c   :  { %2280 = vrcp.f32 %v1326_v60  ;;  %v2277_v7 = vpop.eup %2276  ;;  %v1208_v49 = vmul.f32 %v2275_v45, %v2261_v39 }
 0xe2d   :  { %v1207_v8 = vmul.f32 %v2277_v7, %v2840_v35 }
 0xe2e   :  { %v1211_v6 = vpop.permute.xlu1 %1210 }
 0xe2f   :  { %v1209_v9 = vpack.c.bf16 %v1208_v49, %v1207_v8 }
 0xe30   :  { %v1451_v62 = vpop.xlane.xlu0 %1450 }
 0xe31   :  { %2282 = vrcp.f32 %v1451_v62 }
 0xe32   :  { %v1336_v11 = vpop.permute.xlu1 %1335 }
 0xe34   :  { %v1085_v5 = vpop.permute.xlu0 %1084 }
 0xe35   :  { %2063 = vmatpush3.bf16.msra.mxu1 %v1085_v5  ;;  %v2279_v10 = vpop.eup %2278 }
 0xe36   :  { %2074 = vmatprep.subr.bf16.mxu1 %v2443_v15  ;;  %v2281_v13 = vpop.eup %2280  ;;  %v1333_v14 = vmul.f32 %v2279_v10, %v2265_v46 }
 0xe37   :  { %v1332_v16 = vmul.f32 %v2281_v13, %v2263_v43 }
 0xe38   :  { %2065 = vmatmul.mubr.msk.bf16.vlgmr.msra.gmra.mrb[32].mxu1 %vm294_vm3, %v1082_v12 }
 0xe39   :  { %2075 = vmatpush3.bf16.msra.mxu1 %v1211_v6  ;;  %2076 = vmatprep.mubr.msk.bf16.mxu1 %vm2444_vm1, %v2443_v15  ;;  %v1334_v17 = vpack.c.bf16 %v1333_v14, %v1332_v16 }
 0xe3a   :  { %2086 = vmatprep.subr.bf16.mxu1 %v2443_v15 }
 0xe3b   :  { %v2283_v20 = vpop.eup %2282 }
 0xe3c   :  { %v1457_v23 = vmul.f32 %v2283_v20, %v2847_v48  ;;  %v2204_v20 = vld [vmem:[%s2974_s9] sm:$0xff]  }
 0xe40   :  { %2077 = vmatmul.mubr.msk.bf16.vlgmr.msra.gmra.mrb[36].mxu1 %vm294_vm3, %v1209_v9 }
 0xe41   :  { %2087 = vmatpush3.bf16.msra.mxu1 %v1336_v11  ;;  %2088 = vmatprep.mubr.msk.bf16.mxu1 %vm2444_vm1, %v2443_v15 }
 0xe42   :  { %2098 = vmatprep.subr.bf16.mxu1 %v2443_v15 }
 0xe48   :  { %2089 = vmatmul.mubr.msk.bf16.vlgmr.msra.gmra.mrb[40].mxu1 %vm294_vm3, %v1334_v17 }
 0xe49   :  { %2100 = vmatprep.mubr.msk.bf16.mxu1 %vm2444_vm1, %v2443_v15 }
 0xe63   :  { %v1454_v18 = vpop.xlane.xlu1 %1453 }
 0xe64   :  { %2284 = vrcp.f32 %v1454_v18 }
 0xe67   :  { %v1461_v19 = vpop.permute.xlu1 %1460 }
 0xe68   :  { %2099 = vmatpush3.bf16.msra.mxu1 %v1461_v19 }
 0xe69   :  { %2112 = vmatprep.subr.bf16.mxu1 %v2443_v15 }
 0xe6e   :  { %v2285_v21 = vpop.eup %2284 }
 0xe6f   :  { %v1458_v25 = vmul.f32 %v2285_v21, %v2269_v54  ;;  %v2205_v21 = vld [vmem:[%s2974_s9 + $0x8] sm:$0xff]  }
 0xe71   :  { %v1459_v24 = vpack.c.bf16 %v1458_v25, %v1457_v23 }
 0xe73   :  { %2101 = vmatmul.mubr.msk.bf16.vlgmr.msra.gmra.mrb[44].mxu1 %vm294_vm3, %v1459_v24 }
 0xe74   :  { %2116 = vmatprep.mubr.msk.bf16.mxu1 %vm2444_vm1, %v2443_v15  ;;  %2113 = vmatpush3.bf16.msra.mxu1 %v2204_v20 }
 0xe75   :  { %2114 = vmatprep.subr.bf16.mxu1 %v2443_v15 }
 0xe78   :  { %2115 = vmatpush3.bf16.msra.mxu1 %v2205_v21 }
 0xf0b   :  { %v1124_v26 = vpop.f32.mrb[32].mxu1 }
 0xf0c   :  { %v2066_v22 = vpop.f32.mrb[33].mxu1 }
 0xf0d   :  { %v1127_v27 = vpop.f32.mrb[34].mxu1 }
 0xf0e   :  { %v2067_v28 = vpop.f32.mrb[35].mxu1 }
 0xf13   :  { %v1250_v30 = vpop.f32.mrb[36].mxu1 }
 0xf14   :  { %v2078_v31 = vpop.f32.mrb[37].mxu1 }
 0xf15   :  { %v1253_v33 = vpop.f32.mrb[38].mxu1  ;;  %v1902_v31 = vld [vmem:[#allocation10 + $0x4] ss:$0 sm:$0xff] }
 0xf16   :  { %v2179_v35 = vpack.i.bf16 %v1253_v33, %v1250_v30  ;;  %v2079_v36 = vpop.f32.mrb[39].mxu1 }
 0xf17   :  { %v1903_v36 = vld [vmem:[#allocation10 + $0x5] ss:$0 sm:$0xff] }
 0xf18   :  { %2180 = vrot.lane.b32.xlu0 %v2179_v35, %s2442_s16 }
 0xf1b   :  { %v1375_v0 = vpop.f32.mrb[40].mxu1 }
 0xf1c   :  { %v2090_v37 = vpop.f32.mrb[41].mxu1 }
 0xf1d   :  { %v1378_v38 = vpop.f32.mrb[42].mxu1 }
 0xf1e   :  { %v2184_v39 = vpack.i.bf16 %v1378_v38, %v1375_v0  ;;  %v2091_v1 = vpop.f32.mrb[43].mxu1 }
 0xf1f   :  { %v2206_v1 = vld [vmem:[%s2975_s10] sm:$0xff]  }
 0xf20   :  { %2185 = vrot.lane.b32.xlu1 %v2184_v39, %s2455_s14 }
 0xf46   :  { %v1500_v40 = vpop.f32.mrb[44].mxu1 }
 0xf47   :  { %v2102_v42 = vpop.f32.mrb[45].mxu1 }
 0xf48   :  { %v1503_v43 = vpop.f32.mrb[46].mxu1  ;;  %v2209_v42 = vld [vmem:[%s2975_s10 + $0x18] sm:$0xff]  }
 0xf49   :  { %v2189_v44 = vpack.i.bf16 %v1503_v43, %v1500_v40  ;;  %v2103_v46 = vpop.f32.mrb[47].mxu1  ;;  %v2208_v40 = vld [vmem:[%s2975_s10 + $0x10] sm:$0xff]   ;;  %v2210_v43 = vld [vmem:[%s2975_s10 + $0x20] sm:$0xff]  }
 0xf4a   :  { %v2212_v46 = vld [vmem:[%s2975_s10 + $0x30] sm:$0xff]  }
 0xf4b   :  { %2190 = vrot.lane.b32.xlu0 %v2189_v44, %s2456_s6  ;;  %v2211_v44 = vld [vmem:[%s2975_s10 + $0x28] sm:$0xff]  }
 0xf8a   :  { %v2181_v47 = vpop.permute.xlu0 %2180 }
 0xf8b   :  { %v2183_v50 = vunpack.i.h.bf16 %v2181_v47  ;;  %v2182_v51 = vunpack.i.l.bf16 %v2181_v47  ;;  %v2213_v47 = vld [vmem:[%s2975_s10 + $0x38] sm:$0xff]   ;;  %s2457_s10 = smov [#allocation11]  }
 0xf8c   :  { %s1848_s29 = sshll.u32 %s2457_s10, 4  ;;  %s1849_s29 = int_to_ptr.vmem [resolvable:$true] %s1848_s29 }
 0xf8d   :  { %v1532_v55 = vsel %vm242_vm2, %v1127_v27, %v2183_v50  ;;  %v1531_v56 = vsel %vm242_vm2, %v1124_v26, %v2182_v51  ;;  %s2404_s13 = scalar_lea.vmem %s1849_s29, 256  ;;  %p2409_p13 = scmp.lt.s32.totalorder %s1849_s29, %s1849_s29 }
 0xf8e   :  { %p2405_p12 = scmp.ne.s32.totalorder %s1849_s29, %s2404_s13  ;;  %p2410_p0 = scmp.lt.s32.totalorder %s2404_s13, %s2404_s13 }
 0xf90   :  { %p2411_p1 = por %p2410_p0, %p2409_p13 }
 0xf92   :  { %v2186_v48 = vpop.permute.xlu1 %2185  ;;  %p2412_p2 = pnand %p2411_p1, %p2405_p12 }
 0xf93   :  { %v2188_v52 = vunpack.i.h.bf16 %v2186_v48  ;;  %v2187_v53 = vunpack.i.l.bf16 %v2186_v48  ;;  %v1904_v48 = vld [vmem:[#allocation10 + $0xc] ss:$0 sm:$0xff] }
 0xf95   :  { %v1534_v59 = vsel %vm294_vm3, %v1532_v55, %v2188_v52  ;;  %v1533_v60 = vsel %vm294_vm3, %v1531_v56, %v2187_v53 }
 0xfbd   :  { %v2191_v54 = vpop.permute.xlu0 %2190 }
 0xfbe   :  { %v2193_v57 = vunpack.i.h.bf16 %v2191_v54  ;;  %v2192_v58 = vunpack.i.l.bf16 %v2191_v54 }
 0xfc0   :  { %v1536_v61 = vsel %vm768_vm4, %v1534_v59, %v2193_v57  ;;  %v1535_v62 = vsel %vm768_vm4, %v1533_v60, %v2192_v58 }
 0xfc1   :  { %v1537_v63 = vpack.c.bf16 %v1536_v61, %v1535_v62 }
 0xfc3   :  { %2109 = vmatmul.mubr.msk.bf16.vlgmr.msra.gmra.mrb[32].mxu0 %vm133_vm0, %v1537_v63 }
 0xfc4   :  { %2136 = vmatprep.mubr.msk.bf16.mxu0 %vm2444_vm1, %v2443_v15  ;;  %2121 = vmatpush3.bf16.msra.mxu0 %v2206_v1 }
 0xfc5   :  { %2122 = vmatprep.subr.bf16.mxu0 %v2443_v15 }
 0xfc8   :  { %2123 = vmatpush3.bf16.msra.mxu0 %v2207_v41 }
 0xfc9   :  { %2124 = vmatprep.subr.bf16.mxu0 %v2443_v15 }
 0xfcc   :  { %2125 = vmatpush3.bf16.msra.mxu0 %v2208_v40 }
 0xfcd   :  { %2126 = vmatprep.subr.bf16.mxu0 %v2443_v15 }
 0xfd0   :  { %2127 = vmatpush3.bf16.msra.mxu0 %v2209_v42 }
 0xfd1   :  { %2128 = vmatprep.subr.bf16.mxu0 %v2443_v15 }
 0xfd4   :  { %2129 = vmatpush3.bf16.msra.mxu0 %v2210_v43 }
 0xfd5   :  { %2130 = vmatprep.subr.bf16.mxu0 %v2443_v15 }
 0xfd8   :  { %2131 = vmatpush3.bf16.msra.mxu0 %v2211_v44 }
 0xfd9   :  { %2132 = vmatprep.subr.bf16.mxu0 %v2443_v15 }
 0xfdc   :  { %2133 = vmatpush3.bf16.msra.mxu0 %v2212_v46 }
 0xfdd   :  { %2134 = vmatprep.subr.bf16.mxu0 %v2443_v15 }
 0xfe0   :  { %2135 = vmatpush3.bf16.msra.mxu0 %v2213_v47 }
0x1096   :  { %v1591_v3 = vpop.f32.mrb[32].mxu0 }
0x1097   :  { %v1598_v4 = vadd.f32 %v1591_v3, %v2760_v29  ;;  %v2110_v5 = vpop.f32.mrb[33].mxu0 }
0x1098   :  { %v1594_v12 = vpop.f32.mrb[34].mxu0 }
0x1099   :  { %v2894_v45 = vadd.f32 %v1901_v2, %v1598_v4  ;;  %v1599_v6 = vadd.f32 %v1594_v12, %v2763_v32  ;;  %v2111_v7 = vpop.f32.mrb[35].mxu0 }
0x109b   :  { %v2897_v49 = vadd.f32 %v1901_v2, %v1599_v6  ;;  %v1606_v8 = vsel %vm133_vm0, %v2894_v45, 0.0 }
0x109c   :  { %1607 = vadd.xlane.f32.xlu1 %v1606_v8 }
0x109d   :  { %v1609_v9 = vsel %vm133_vm0, %v2897_v49, 0.0 }
0x109e   :  { %1610 = vadd.xlane.f32.xlu0 %v1609_v9 }
0x1129   :  { %v1608_v10 = vpop.xlane.xlu1 %1607 }
0x112a   :  { %v1612_v11 = vmul.f32 0.03125, %v1608_v10 }
0x112b   :  { %v1611_v29 = vpop.xlane.xlu0 %1610 }
0x112c   :  { %v1614_v13 = vsub.f32 %v2894_v45, %v1612_v11  ;;  %v1613_v14 = vmul.f32 0.03125, %v1611_v29  ;;  %v1916_v11 = vld [vmem:[#allocation10 + $0xb] ss:$0 sm:$0xff] }
0x112e   :  { %v1615_v16 = vsub.f32 %v2897_v49, %v1613_v14  ;;  %v1616_v32 = vmul.f32 %v1614_v13, %v1614_v13 }
0x1130   :  { %v1618_v17 = vsel %vm133_vm0, %v1616_v32, 0.0  ;;  %v1617_v18 = vmul.f32 %v1615_v16, %v1615_v16 }
0x1131   :  { %1619 = vadd.xlane.f32.xlu0 %v1618_v17 }
0x1132   :  { %v1621_v19 = vsel %vm133_vm0, %v1617_v18, 0.0 }
0x1135   :  { %1622 = vadd.xlane.f32.xlu0 %v1621_v19 }
0x11be   :  { %v1620_v23 = vpop.xlane.xlu0 %1619 }
0x11bf   :  { %v1624_v25 = vmul.f32 0.03125, %v1620_v23 }
0x11c1   :  { %v1626_v24 = vadd.f32 1e-05, %v1624_v25 }
0x11c2   :  { %v1623_v26 = vpop.xlane.xlu0 %1622 }
0x11c3   :  { %2286 = vrsqrt.f32 %v1626_v24  ;;  %v1625_v22 = vmul.f32 0.03125, %v1623_v26 }
0x11c5   :  { %v1627_v27 = vadd.f32 1e-05, %v1625_v22 }
0x11c7   :  { %2288 = vrsqrt.f32 %v1627_v27 }
0x11cd   :  { %v2287_v28 = vpop.eup %2286 }
0x11ce   :  { %v1630_v30 = vmul.f32 %v2287_v28, %v1614_v13 }
0x11d0   :  { %v1636_v34 = vmul.f32 %v1902_v31, %v1630_v30 }
0x11d1   :  { %v2289_v33 = vpop.eup %2288 }
0x11d2   :  { %v1631_v35 = vmul.f32 %v2289_v33, %v1615_v16  ;;  %v1642_v37 = vadd.f32 %v1903_v36, %v1636_v34 }
0x11d4   :  { %v1637_v0 = vmul.f32 %v1902_v31, %v1631_v35 }
0x11d6   :  { %v1643_v38 = vadd.f32 %v1903_v36, %v1637_v0 }
0x11d8   :  { %v1644_v39 = vpack.c.bf16 %v1643_v38, %v1642_v37 }
0x11da   :  { %2117 = vmatmul.mubr.msk.bf16.vlgmr.msra.gmra.mrb[48].mxu1 %vm133_vm0, %v1644_v39 }
0x12ad   :  { %v1702_v50 = vpop.f32.mrb[48].mxu1 }
0x12ae   :  { %v1703_v51 = vadd.f32 %v1904_v48, %v1702_v50  ;;  %v2118_v52 = vpop.f32.mrb[49].mxu1 }
0x12af   :  { %v1705_v53 = vpop.f32.mrb[50].mxu1 }
0x12b0   :  { %v1711_v54 = vmul.f32 0.044715, %v1703_v51  ;;  %v1706_v55 = vadd.f32 %v1904_v48, %v1705_v53  ;;  %v2119_v56 = vpop.f32.mrb[51].mxu1  ;;  %v1709_v12 = vmul.f32 0.5, %v1703_v51 }
0x12b2   :  { %v1713_v57 = vmul.f32 %v1711_v54, %v1703_v51  ;;  %v1712_v58 = vmul.f32 0.044715, %v1706_v55  ;;  %v1710_v6 = vmul.f32 0.5, %v1706_v55 }
0x12b4   :  { %v1715_v59 = vmul.f32 %v1713_v57, %v1703_v51  ;;  %v1714_v60 = vmul.f32 %v1712_v58, %v1706_v55 }
0x12b6   :  { %v1717_v61 = vadd.f32 %v1715_v59, %v1703_v51  ;;  %v1716_v62 = vmul.f32 %v1714_v60, %v1706_v55 }
0x12b8   :  { %v1719_v63 = vmul.f32 0.7978846, %v1717_v61  ;;  %v1718_v2 = vadd.f32 %v1716_v62, %v1706_v55 }
0x12ba   :  { %2290 = vtanh.f32 %v1719_v63  ;;  %v1720_v3 = vmul.f32 0.7978846, %v1718_v2 }
0x12bc   :  { %2292 = vtanh.f32 %v1720_v3 }
0x12c4   :  { %v2291_v15 = vpop.eup %2290 }
0x12c5   :  { %v1723_v4 = vadd.f32 1.0, %v2291_v15 }
0x12c6   :  { %v2293_v5 = vpop.eup %2292 }
0x12c7   :  { %v1724_v7 = vadd.f32 1.0, %v2293_v5  ;;  %v1725_v8 = vmul.f32 %v1723_v4, %v1709_v12 }
0x12c9   :  { %v1726_v9 = vmul.f32 %v1724_v7, %v1710_v6 }
0x12cb   :  { %v1727_v10 = vpack.c.bf16 %v1726_v9, %v1725_v8 }
0x12cd   :  { %2137 = vmatmul.mubr.bf16.vlgmr.msra.gmra.mrb[36].mxu0 %v1727_v10 }
0x13a0   :  { %v1826_v29 = vpop.f32.mrb[36].mxu0 }
0x13a1   :  { %v1833_v13 = vadd.f32 %v1826_v29, %v2894_v45  ;;  %v2138_v14 = vpop.f32.mrb[37].mxu0 }
0x13a2   :  { %v1829_v16 = vpop.f32.mrb[38].mxu0 }
0x13a3   :  { %v1839_v32 = vadd.f32 %v1916_v11, %v1833_v13  ;;  %v1834_v17 = vadd.f32 %v1829_v16, %v2897_v49  ;;  %v2139_v18 = vpop.f32.mrb[39].mxu0 }
0x13a5   :  { %1841 = vst.msk [vmem:[#allocation11] sm:$0xff] %vm133_vm0, %v1839_v32  ;;  %v1840_v19 = vadd.f32 %v1916_v11, %v1834_v17 }
0x13a7   :  { %1842 = vst.msk [vmem:[#allocation11 + $0x8] sm:$0xff] %vm133_vm0, %v1840_v19 }
0x13a8   :  { %2415 = shalt.err (!%p2412_p2)
}
0x13a9   :  { %s2416_s0 = scalar_lea.hbm %s2977_s12, 256 }
0x13aa   :  { %p2417_p3 = scmp.ne.s32.totalorder %s2977_s12, %s2416_s0  ;;  %p2420_p4 = scmp.lt.u32.totalorder %s2416_s0, %s2977_s12 }
0x13ac   :  { %p2422_p5 = pnand %p2420_p4, %p2417_p3 }
0x13ae   :  { %2425 = shalt.err (!%p2422_p5)
}
0x13af   :  { %1854 = dma.vmem_to_hbm [thread:$0]  %s1849_s29, 256, %s2977_s12, [#allocation4], %s2441_s7, %s2441_s7, %s2442_s16  }
0x13b0   :  { %2432 = dma.done.wait [#allocation4], 256  }
0x13b1   :  { %2433 = vsyncadd [#allocation4], 4294967040 }
0x13b2   :  { %1858 = vsyncpa [#allocation3], 1 }
0x13b3   :  { %1859 = vsyncpa [#allocation6], 1 }
0x13b4   :  { %1860 = vsyncpa [#allocation9], 1 }
0x13b5   :  { %1861 = vsyncpa [#allocation4], 1 }

</bundles_post_ra>
